<compile_context>
chip_gen: v7x
topology: tpu7x:2x2x1
jax: 0.10.0
libtpu: 0.0.40
codegen_flags: <defaults>
</compile_context>

<pallas_src>
from typing import NamedTuple

import numpy as np

import jax
import jax.numpy as jnp
from jax import lax
from jax.experimental import pallas as pl
from jax.experimental.pallas import tpu as pltpu


# ----------------------------------------------------------------------------
# Static layout shared between fuse-time (weight construction) and call-time.
# ----------------------------------------------------------------------------
class _Layout(NamedTuple):
    bias_col: int   # shared ones-column in the LHS (= max 9*Cin over maps)
    k_pad: int      # LHS lane width (>=128, multiple of 128)
    loc_blk: int    # per-map column block width inside the loc output
    conf_blk: int   # per-map column block width inside the conf output
    loc_w: int      # total loc output width (multiple of 128)
    conf_w: int     # total conf output width (multiple of 128)


def _round_up(x, m):
    return ((x + m - 1) // m) * m


def _layout(cins, prior_boxes, num_of_classes):
    n_maps = len(cins)
    k_max = 9 * max(cins)
    loc_blk = max(pb * 4 for pb in prior_boxes)
    conf_blk = max(pb * num_of_classes for pb in prior_boxes)
    return _Layout(
        bias_col=k_max,
        k_pad=_round_up(k_max + 1, 128),
        loc_blk=loc_blk,
        conf_blk=conf_blk,
        loc_w=_round_up(n_maps * loc_blk, 128),
        conf_w=_round_up(n_maps * conf_blk, 128),
    )


# ----------------------------------------------------------------------------
# Pallas kernel: assemble the shared LHS in VMEM, one MXU matmul, two
# lane-dense stores (loc / conf).
# ----------------------------------------------------------------------------
def _make_multibox_kernel(n_maps, bias_col, loc_w):
    """Kernel refs: (patches_0..patches_{n-1}, fused_w, o_loc, o_conf, lhs)."""

    def kernel(*refs):
        p_refs = refs[:n_maps]
        w_ref = refs[n_maps]
        o_loc_ref = refs[n_maps + 1]
        o_conf_ref = refs[n_maps + 2]
        lhs_ref = refs[n_maps + 3]

        m_tot, k_pad = lhs_ref.shape
        # One full-width store initialises the LHS: zeros everywhere except a
        # shared ones-column that realises the bias row of the fused weight.
        col = lax.broadcasted_iota(jnp.int32, (m_tot, k_pad), 1)
        lhs_ref[...] = jnp.where(col == bias_col, 1.0, 0.0).astype(lhs_ref.dtype)

        # Scatter each map's im2col rows into its (sublane-aligned) row block.
        row = 0
        for p_ref in p_refs:
            m_i, k_i = p_ref.shape
            lhs_ref[row:row + m_i, 0:k_i] = p_ref[...]
            row += m_i

        # Single MXU fill/drain covering every map's loc+conf head (+bias).
        acc = jnp.dot(lhs_ref[...], w_ref[...],
                      preferred_element_type=jnp.float32)

        # Split at the 128-lane tile boundary -> two unmasked lane-dense stores.
        o_loc_ref[...] = acc[:, :loc_w].astype(o_loc_ref.dtype)
        o_conf_ref[...] = acc[:, loc_w:].astype(o_conf_ref.dtype)

    return kernel


# ----------------------------------------------------------------------------
# Hoisted (once, outside jit): fused weight construction.
# ----------------------------------------------------------------------------
def _patches_feature_perm(cin):
    """perm[j] = canonical (dy, dx, c) flat index feeding patch feature j.

    Discovered numerically on a tiny probe so the fused weight rows always
    match whatever feature ordering lax.conv_general_dilated_patches emits.
    """
    probe = jnp.arange(9 * cin, dtype=jnp.float32).reshape(3, 3, cin)  # [dy,dx,c]
    probe = jnp.transpose(probe, (2, 0, 1))[None]                      # (1,cin,3,3)
    taps = lax.conv_general_dilated_patches(
        probe, (3, 3), (1, 1), 'VALID',
        dimension_numbers=('NCHW', 'HWIO', 'NHWC'))                    # (1,1,1,9cin)
    return np.asarray(taps).reshape(9 * cin).round().astype(np.int32)


def fuse_multibox_params(loc_params, conf_params, num_of_classes):
    """Build the single fused (k_pad, loc_w+conf_w) weight ONCE (incl. biases).

    Per map i:
        rows [0:9*Cin_i], cols [i*loc_blk : +loc_cout]            = loc weights
        rows [0:9*Cin_i], cols [loc_w + i*conf_blk : +conf_cout]  = conf weights
        row  [bias_col], same column ranges                       = biases
    Everything else is zero, so the shared-K single-matmul kernel is exact.
    """
    cins = tuple(int(lw.shape[2]) for lw, _ in loc_params)
    prior_boxes = tuple(int(lw.shape[3]) // 4 for lw, _ in loc_params)
    lay = _layout(cins, prior_boxes, num_of_classes)

    fused = np.zeros((lay.k_pad, lay.loc_w + lay.conf_w), np.float32)
    for i, ((lw, lb), (cw, cb)) in enumerate(zip(loc_params, conf_params)):
        cin = cins[i]
        k_i = 9 * cin
        perm = _patches_feature_perm(cin)
        lw_c = np.asarray(lw, np.float32).reshape(k_i, -1)   # canonical (dy,dx,c)
        cw_c = np.asarray(cw, np.float32).reshape(k_i, -1)
        lo = i * lay.loc_blk
        co = lay.loc_w + i * lay.conf_blk
        fused[:k_i, lo:lo + lw_c.shape[1]] = lw_c[perm]
        fused[:k_i, co:co + cw_c.shape[1]] = cw_c[perm]
        fused[lay.bias_col, lo:lo + lw_c.shape[1]] = np.asarray(lb, np.float32)
        fused[lay.bias_col, co:co + cw_c.shape[1]] = np.asarray(cb, np.float32)
    return jnp.asarray(fused), prior_boxes


# ----------------------------------------------------------------------------
# Forward pass (jit this; prior_boxes / num_of_classes are static).
# ----------------------------------------------------------------------------
def multibox_forward(f_maps_nchw, fused_weight, prior_boxes, num_of_classes):
    """Matches MultiBoxLayer.forward: returns (pred_locs, pred_confs)."""
    cins = tuple(int(f.shape[1]) for f in f_maps_nchw)
    lay = _layout(cins, tuple(prior_boxes), num_of_classes)

    patches, metas = [], []
    for f_map in f_maps_nchw:
        n, c, h, w = f_map.shape
        # Single fused op per map: 3x3 SAME patches, NCHW in -> NHWC out.
        p = lax.conv_general_dilated_patches(
            f_map, (3, 3), (1, 1), 'SAME',
            dimension_numbers=('NCHW', 'HWIO', 'NHWC'))      # (N, H, W, 9*C)
        patches.append(p.reshape(n * h * w, 9 * c))
        metas.append((n, h, w))
    m_tot = sum(p.shape[0] for p in patches)

    kernel = _make_multibox_kernel(len(patches), lay.bias_col, lay.loc_w)

    # No grid: total padded footprint here is ~1.3 MiB f32, far below even the
    # default scoped-VMEM limit, so all arrays are VMEM-resident and the whole
    # multibox head is a single launch / single MXU matmul.
    # TODO(synk): for production SSD sizes (e.g. 38x38x512 maps, batch>=8) add
    # an M-tiled BlockSpec grid with dimension_semantics=("parallel",) so the
    # LHS is streamed through VMEM and v7x's second TensorCore is used.
    o_loc, o_conf = pl.pallas_call(
        kernel,
        out_shape=(jax.ShapeDtypeStruct((m_tot, lay.loc_w), jnp.float32),
                   jax.ShapeDtypeStruct((m_tot, lay.conf_w), jnp.float32)),
        in_specs=[pl.BlockSpec(memory_space=pltpu.MemorySpace.VMEM)
                  for _ in range(len(patches) + 1)],
        out_specs=(pl.BlockSpec(memory_space=pltpu.MemorySpace.VMEM),
                   pl.BlockSpec(memory_space=pltpu.MemorySpace.VMEM)),
        scratch_shapes=[pltpu.VMEM((m_tot, lay.k_pad), jnp.float32)],
    )(*patches, fused_weight)

    # Slice off the lane padding and reshape exactly like
    # permute(0,2,3,1).contiguous().view(n, -1, k) in the PyTorch module.
    locs, confs = [], []
    row = 0
    for i, (n, h, w) in enumerate(metas):
        m_i = n * h * w
        pb = prior_boxes[i]
        lc, cc = pb * 4, pb * num_of_classes
        lo, co = i * lay.loc_blk, i * lay.conf_blk
        locs.append(o_loc[row:row + m_i, lo:lo + lc].reshape(n, h * w * pb, 4))
        confs.append(o_conf[row:row + m_i, co:co + cc]
                     .reshape(n, h * w * pb, num_of_classes))
        row += m_i
    return jnp.concatenate(locs, axis=1), jnp.concatenate(confs, axis=1)


# ----------------------------------------------------------------------------
# Parameter construction (replicates MultiBoxLayer.__init__ shapes).
# ----------------------------------------------------------------------------
def build_multibox_params(config, base_out_channels, num_of_classes, key):
    in_channels = []
    for source in config['base_source_maps']:
        in_channels.append(base_out_channels[source])
    cfg_extra = [c for c in config['extras']['config'] if c != 'S']
    for depth in cfg_extra[1::2]:
        in_channels.append(depth)

    loc_params, conf_params = [], []
    for i, cin in enumerate(in_channels):
        pb = config['prior_boxes'][i]
        k = jax.random.fold_in(key, i)
        k1, k2, k3, k4 = jax.random.split(k, 4)
        loc_cout = pb * 4
        conf_cout = pb * num_of_classes
        loc_params.append((
            0.05 * jax.random.normal(k1, (3, 3, cin, loc_cout), jnp.float32),
            0.05 * jax.random.normal(k2, (loc_cout,), jnp.float32),
        ))
        conf_params.append((
            0.05 * jax.random.normal(k3, (3, 3, cin, conf_cout), jnp.float32),
            0.05 * jax.random.normal(k4, (conf_cout,), jnp.float32),
        ))
    return loc_params, conf_params


# ----------------------------------------------------------------------------
# Pure-XLA reference of the same forward pass (for the numerical check).
# ----------------------------------------------------------------------------
def _multibox_ref(f_maps_nchw, loc_params, conf_params, num_of_classes):
    locs, confs = [], []
    for i, f_map in enumerate(f_maps_nchw):
        x = jnp.transpose(f_map, (0, 2, 3, 1))
        for (w, b), k, dst in ((loc_params[i], 4, locs),
                               (conf_params[i], num_of_classes, confs)):
            y = lax.conv_general_dilated(
                x, w, window_strides=(1, 1), padding='SAME',
                dimension_numbers=('NHWC', 'HWIO', 'NHWC'),
                precision=lax.Precision.HIGHEST) + b[None, None, None, :]
            dst.append(y.reshape(y.shape[0], -1, k))
    return jnp.concatenate(locs, axis=1), jnp.concatenate(confs, axis=1)


if __name__ == "__main__":
    num_of_classes = 3
    # Two base source maps (channels 4, 8) + two extra maps (channels 8, 8).
    base_out_channels = [4, 8]
    config = {
        'base_source_maps': [0, 1],
        'prior_boxes': [4, 6, 6, 4],
        'extras': {'config': [16, 8, 'S', 16, 8]},   # filtered[1::2] -> [8, 8]
    }

    key = jax.random.PRNGKey(0)
    loc_params, conf_params = build_multibox_params(
        config, base_out_channels, num_of_classes, key)

    # Hoisted out of the per-call path: fused weight built once.
    fused_w, prior_boxes = fuse_multibox_params(
        loc_params, conf_params, num_of_classes)

    # Feature maps in PyTorch NCHW convention.
    kx = jax.random.split(jax.random.fold_in(key, 123), 4)
    f_maps = [
        jax.random.normal(kx[0], (2, 4, 16, 16), jnp.float32),
        jax.random.normal(kx[1], (2, 8, 8, 8), jnp.float32),
        jax.random.normal(kx[2], (2, 8, 4, 4), jnp.float32),
        jax.random.normal(kx[3], (2, 8, 2, 2), jnp.float32),
    ]

    fwd = jax.jit(multibox_forward, static_argnums=(2, 3))
    pred_locs, pred_confs = fwd(f_maps, fused_w, prior_boxes, num_of_classes)
    jax.block_until_ready((pred_locs, pred_confs))

    # Shape check: total anchors = 16*16*4 + 8*8*6 + 4*4*6 + 2*2*4 = 1520
    assert pred_locs.shape == (2, 1520, 4), pred_locs.shape
    assert pred_confs.shape == (2, 1520, num_of_classes), pred_confs.shape

    # Numerical check of the fused Pallas head against XLA's conv (f32, tight).
    ref_locs, ref_confs = _multibox_ref(
        f_maps, loc_params, conf_params, num_of_classes)
    assert jnp.allclose(pred_locs, ref_locs, atol=1e-4, rtol=1e-4)
    assert jnp.allclose(pred_confs, ref_confs, atol=1e-4, rtol=1e-4)

    print("KERNEL_OK")
</pallas_src>

<mosaic_0001>
module attributes {stable_mosaic.version = 11 : i64} {
  func.func @kernel(%arg0: memref<512x36xf32, #tpu.memory_space<vmem>>, %arg1: memref<128x72xf32, #tpu.memory_space<vmem>>, %arg2: memref<32x72xf32, #tpu.memory_space<vmem>>, %arg3: memref<8x72xf32, #tpu.memory_space<vmem>>, %arg4: memref<128x256xf32, #tpu.memory_space<vmem>>, %arg5: memref<680x128xf32, #tpu.memory_space<vmem>>, %arg6: memref<680x128xf32, #tpu.memory_space<vmem>>, %arg7: memref<680x128xf32, #tpu.memory_space<vmem>>) attributes {dimension_semantics = [], scalar_prefetch = 0 : i64, scratch_operands = 1 : i64, tpu.core_type = #tpu.core_type<tc>} {
    %0 = tpu.iota {dimensions = array<i32: 1>} : vector<680x128xi32>
    %c72_i32 = arith.constant 72 : i32
    %1 = vector.broadcast %c72_i32 : i32 to vector<680x128xi32>
    %2 = arith.cmpi eq, %0, %1 : vector<680x128xi32>
    %cst = arith.constant 1.000000e+00 : f32
    %cst_0 = arith.constant 0.000000e+00 : f32
    %3 = vector.broadcast %cst : f32 to vector<680x128xf32>
    %4 = vector.broadcast %cst_0 : f32 to vector<680x128xf32>
    %5 = arith.select %2, %3, %4 : vector<680x128xi1>, vector<680x128xf32>
    %c0 = arith.constant 0 : index
    %c0_1 = arith.constant 0 : index
    %6 = vector.load %arg7[%c0, %c0_1] : memref<680x128xf32, #tpu.memory_space<vmem>>, vector<680x128xf32>
    tpu.vector_store %arg7[%c0, %c0_1], %5 {strides = array<i32>} : memref<680x128xf32, #tpu.memory_space<vmem>>, vector<680x128xf32>,
    %c0_2 = arith.constant 0 : index
    %c0_3 = arith.constant 0 : index
    %7 = vector.load %arg0[%c0_2, %c0_3] : memref<512x36xf32, #tpu.memory_space<vmem>>, vector<512x36xf32>
    %c0_4 = arith.constant 0 : index
    %c0_5 = arith.constant 0 : index
    %8 = vector.load %arg7[%c0_4, %c0_5] : memref<680x128xf32, #tpu.memory_space<vmem>>, vector<512x36xf32>
    tpu.vector_store %arg7[%c0_4, %c0_5], %7 {strides = array<i32>} : memref<680x128xf32, #tpu.memory_space<vmem>>, vector<512x36xf32>,
    %c0_6 = arith.constant 0 : index
    %c0_7 = arith.constant 0 : index
    %9 = vector.load %arg1[%c0_6, %c0_7] : memref<128x72xf32, #tpu.memory_space<vmem>>, vector<128x72xf32>
    %c512 = arith.constant 512 : index
    %c0_8 = arith.constant 0 : index
    %10 = vector.load %arg7[%c512, %c0_8] : memref<680x128xf32, #tpu.memory_space<vmem>>, vector<128x72xf32>
    tpu.vector_store %arg7[%c512, %c0_8], %9 {strides = array<i32>} : memref<680x128xf32, #tpu.memory_space<vmem>>, vector<128x72xf32>,
    %c0_9 = arith.constant 0 : index
    %c0_10 = arith.constant 0 : index
    %11 = vector.load %arg2[%c0_9, %c0_10] : memref<32x72xf32, #tpu.memory_space<vmem>>, vector<32x72xf32>
    %c640 = arith.constant 640 : index
    %c0_11 = arith.constant 0 : index
    %12 = vector.load %arg7[%c640, %c0_11] : memref<680x128xf32, #tpu.memory_space<vmem>>, vector<32x72xf32>
    tpu.vector_store %arg7[%c640, %c0_11], %11 {strides = array<i32>} : memref<680x128xf32, #tpu.memory_space<vmem>>, vector<32x72xf32>,
    %c0_12 = arith.constant 0 : index
    %c0_13 = arith.constant 0 : index
    %13 = vector.load %arg3[%c0_12, %c0_13] : memref<8x72xf32, #tpu.memory_space<vmem>>, vector<8x72xf32>
    %c672 = arith.constant 672 : index
    %c0_14 = arith.constant 0 : index
    %14 = vector.load %arg7[%c672, %c0_14] : memref<680x128xf32, #tpu.memory_space<vmem>>, vector<8x72xf32>
    tpu.vector_store %arg7[%c672, %c0_14], %13 {strides = array<i32>} : memref<680x128xf32, #tpu.memory_space<vmem>>, vector<8x72xf32>,
    %c0_15 = arith.constant 0 : index
    %c0_16 = arith.constant 0 : index
    %15 = vector.load %arg7[%c0_15, %c0_16] : memref<680x128xf32, #tpu.memory_space<vmem>>, vector<680x128xf32>
    %c0_17 = arith.constant 0 : index
    %c0_18 = arith.constant 0 : index
    %16 = vector.load %arg4[%c0_17, %c0_18] : memref<128x256xf32, #tpu.memory_space<vmem>>, vector<128x256xf32>
    %cst_19 = arith.constant dense<0.000000e+00> : vector<680x256xf32>
    %17 = tpu.matmul %15, %16, %cst_19 {dimension_numbers = #tpu.dot_dimension_numbers<[1], [0], [0], [1], [0, 0, 1, 1], [], []>} : vector<680x128xf32>, vector<128x256xf32>, vector<680x256xf32> -> vector<680x256xf32>
    %18 = vector.extract_strided_slice %17 {offsets = [0, 0], sizes = [680, 128], strides = [1, 1]} : vector<680x256xf32> to vector<680x128xf32>
    %c0_20 = arith.constant 0 : index
    %c0_21 = arith.constant 0 : index
    %19 = vector.load %arg5[%c0_20, %c0_21] : memref<680x128xf32, #tpu.memory_space<vmem>>, vector<680x128xf32>
    tpu.vector_store %arg5[%c0_20, %c0_21], %18 {strides = array<i32>} : memref<680x128xf32, #tpu.memory_space<vmem>>, vector<680x128xf32>,
    %20 = vector.extract_strided_slice %17 {offsets = [0, 128], sizes = [680, 128], strides = [1, 1]} : vector<680x256xf32> to vector<680x128xf32>
    %c0_22 = arith.constant 0 : index
    %c0_23 = arith.constant 0 : index
    %21 = vector.load %arg6[%c0_22, %c0_23] : memref<680x128xf32, #tpu.memory_space<vmem>>, vector<680x128xf32>
    tpu.vector_store %arg6[%c0_22, %c0_23], %20 {strides = array<i32>} : memref<680x128xf32, #tpu.memory_space<vmem>>, vector<680x128xf32>,
    return
  }
}

</mosaic_0001>

<bundles_post_ra>
// kernel: reverse
= control target key start
LH: loop header
LB: loop body
LE: loop exit
PB: predicated region body
PF: predicated region fallthrough
CT: control target
= control target key end

     0   :  { %s143_s0 = inlined_call_operand.vmem [shape: bf16[3,3,8,72], index: 0, kind: input, shape index: {}]   ;;  %s144_s1 = inlined_call_operand.vmem [shape: bf16[3,3,8,72], index: 1, kind: output, shape index: {}]  }
   0x1   :  { %v63_v0 = vld [vmem:[%s143_s0 + $0x20] sm:$0xf]  ;;  %v64_v1 = vld [vmem:[%s143_s0 + $0x14] sm:$0xf]  ;;  %v66_v2 = vld [vmem:[%s143_s0 + $0x8] sm:$0xf] }
   0x2   :  { %7 = vst [vmem:[%s144_s1] sm:$0xf] %v63_v0  ;;  %65 = vst [vmem:[%s144_s1 + $0xc] sm:$0xf] %v64_v1  ;;  %v68_v3 = vld [vmem:[%s143_s0 + $0x1c] sm:$0xf] }
   0x3   :  { %67 = vst [vmem:[%s144_s1 + $0x18] sm:$0xf] %v66_v2  ;;  %v70_v4 = vld [vmem:[%s143_s0 + $0x10] sm:$0xf]  ;;  %v72_v5 = vld [vmem:[%s143_s0 + $0x4] sm:$0xf] }
   0x4   :  { %69 = vst [vmem:[%s144_s1 + $0x4] sm:$0xf] %v68_v3  ;;  %71 = vst [vmem:[%s144_s1 + $0x10] sm:$0xf] %v70_v4  ;;  %v74_v6 = vld [vmem:[%s143_s0 + $0x18] sm:$0xf] }
   0x5   :  { %73 = vst [vmem:[%s144_s1 + $0x1c] sm:$0xf] %v72_v5  ;;  %v76_v7 = vld [vmem:[%s143_s0 + $0xc] sm:$0xf]  ;;  %v57_v8 = vld [vmem:[%s143_s0] sm:$0xf] }
   0x6   :  { %75 = vst [vmem:[%s144_s1 + $0x8] sm:$0xf] %v74_v6  ;;  %77 = vst [vmem:[%s144_s1 + $0x14] sm:$0xf] %v76_v7 }
   0x7   :  { %78 = vst [vmem:[%s144_s1 + $0x20] sm:$0xf] %v57_v8 }

// kernel: multibox_forward.1
= control target key start
LH: loop header
LB: loop body
LE: loop exit
PB: predicated region body
PF: predicated region fallthrough
CT: control target
= control target key end

     0   :  { %v22_v0 = vlaneseq  ;;  %v1202_v4 = vmov 0.0   ;;  %vm175_vm1 = vcmask 293888   ;;  %vm256_vm2 = vcmask 588800   ;;  %s2371_s4 = inlined_call_operand.vmem [shape: f32[128,256], index: 4, kind: input, shape index: {}]   ;;  %s2372_s0 = inlined_call_operand.vmem [shape: f32[512,36], index: 0, kind: input, shape index: {}]   ;;  %s2373_s1 = inlined_call_operand.vmem [shape: f32[128,72], index: 1, kind: input, shape index: {}]   ;;  %s2374_s2 = inlined_call_operand.vmem [shape: f32[32,72], index: 2, kind: input, shape index: {}]   ;;  %s2375_s3 = inlined_call_operand.vmem [shape: f32[8,72], index: 3, kind: input, shape index: {}]   ;;  %s2376_s5 = inlined_call_operand.vmem [shape: f32[680,128], index: 5, kind: output, shape index: {0}]   ;;  %s2377_s6 = inlined_call_operand.vmem [shape: f32[680,128], index: 6, kind: output, shape index: {1}]  }
   0x1   :  { %v369_v1 = vld [vmem:[%s2371_s4 + $0x8] sm:$0xff]  ;;  %v371_v2 = vld [vmem:[%s2371_s4 + $0x18] sm:$0xff]  ;;  %v368_v3 = vld [vmem:[%s2371_s4] sm:$0xff]  ;;  %464 = vmatprep.mubr.f32.mxu0 %v1202_v4  ;;  %722 = vmatprep.mubr.f32.mxu1 %v1202_v4 }
   0x2   :  { %v1153_v5 = vpack.c.bf16 %v371_v2, %v369_v1  ;;  %v370_v6 = vld [vmem:[%s2371_s4 + $0x10] sm:$0xff]  ;;  %v373_v7 = vld [vmem:[%s2371_s4 + $0x28] sm:$0xff]  ;;  %v375_v8 = vld [vmem:[%s2371_s4 + $0x38] sm:$0xff]  ;;  %v23_v9 = vand.u32 127, %v22_v0 }
   0x3   :  { %v1155_v10 = vpack.c.bf16 %v370_v6, %v368_v3  ;;  %v1157_v11 = vpack.c.bf16 %v375_v8, %v373_v7  ;;  %v372_v12 = vld [vmem:[%s2371_s4 + $0x20] sm:$0xff]  ;;  %v374_v13 = vld [vmem:[%s2371_s4 + $0x30] sm:$0xff]  ;;  %v377_v14 = vld [vmem:[%s2371_s4 + $0x48] sm:$0xff] }
   0x4   :  { %1154 = vmatprep.subr.bf16.mxu0 %v1153_v5  ;;  %1185 = vmatprep.subr.bf16.mxu1 %v1153_v5  ;;  %v379_v15 = vld [vmem:[%s2371_s4 + $0x58] sm:$0xff]  ;;  %vm24_vm0 = vcmp.eq.s32.totalorder %v23_v9, 72  ;;  %v1270_v16 = vpack.c.bf16 %v374_v13, %v372_v12  ;;  %v1280_v19 = vld [vmem:[%s2371_s4 + $0x40] sm:$0xff]  ;;  %v1285_v20 = vld [vmem:[%s2371_s4 + $0x50] sm:$0xff] }
   0x5   :  { %1156 = vmatpush1.bf16.msra.mxu0 %v1155_v10  ;;  %1193 = vmatpush1.bf16.msra.mxu1 %v1155_v10  ;;  %v1273_v17 = vsel %vm24_vm0, 1.0, %v1202_v4  ;;  %v1275_v18 = vpack.c.bf16 %v379_v15, %v377_v14  ;;  %v381_v21 = vld [vmem:[%s2371_s4 + $0x68] sm:$0xff]  ;;  %v383_v22 = vld [vmem:[%s2371_s4 + $0x78] sm:$0xff]  ;;  %v1163_v23 = vpack.c.bf16 %v1285_v20, %v1280_v19  ;;  %v380_v25 = vld [vmem:[%s2371_s4 + $0x60] sm:$0xff] }
   0x6   :  { %1158 = vmatprep.subr.bf16.mxu0 %v1157_v11  ;;  %1186 = vmatprep.subr.bf16.mxu1 %v1157_v11  ;;  %26 = vst [vmem:[#allocation2] sm:$0xff] %v1273_v17  ;;  %27 = vst [vmem:[#allocation2 + $0x8] sm:$0xff] %v1273_v17  ;;  %v1165_v24 = vpack.c.bf16 %v383_v22, %v381_v21  ;;  %v382_v26 = vld [vmem:[%s2371_s4 + $0x70] sm:$0xff]  ;;  %v385_v27 = vld [vmem:[%s2371_s4 + $0x88] sm:$0xff] }
   0x7   :  { %28 = vst [vmem:[#allocation2 + $0x10] sm:$0xff] %v1273_v17  ;;  %29 = vst [vmem:[#allocation2 + $0x18] sm:$0xff] %v1273_v17  ;;  %v387_v28 = vld [vmem:[%s2371_s4 + $0x98] sm:$0xff]  ;;  %v111_v29 = vld [vmem:[%s2372_s0] sm:$0xff]  ;;  %v1167_v35 = vpack.c.bf16 %v382_v26, %v380_v25 }
   0x8   :  { %30 = vst [vmem:[#allocation2 + $0x20] sm:$0xff] %v1273_v17  ;;  %31 = vst [vmem:[#allocation2 + $0x28] sm:$0xff] %v1273_v17  ;;  %v384_v30 = vld [vmem:[%s2371_s4 + $0x80] sm:$0xff]  ;;  %v386_v31 = vld [vmem:[%s2371_s4 + $0x90] sm:$0xff]  ;;  %v1169_v41 = vpack.c.bf16 %v387_v28, %v385_v27 }
   0x9   :  { %32 = vst [vmem:[#allocation2 + $0x30] sm:$0xff] %v1273_v17  ;;  %33 = vst [vmem:[#allocation2 + $0x38] sm:$0xff] %v1273_v17  ;;  %1160 = vmatpush1.bf16.msra.mxu0 %v1270_v16  ;;  %1194 = vmatpush1.bf16.msra.mxu1 %v1270_v16  ;;  %v154_v32 = vld [vmem:[%s2372_s0 + $0x158] sm:$0xff]  ;;  %v112_v33 = vld [vmem:[%s2372_s0 + $0x8] sm:$0xff]  ;;  %v1171_v53 = vpack.c.bf16 %v386_v31, %v384_v30 }
   0xa   :  { %34 = vst [vmem:[#allocation2 + $0x40] sm:$0xff] %v1273_v17  ;;  %35 = vst [vmem:[#allocation2 + $0x48] sm:$0xff] %v1273_v17  ;;  %1162 = vmatprep.subr.bf16.mxu0 %v1275_v18  ;;  %1187 = vmatprep.subr.bf16.mxu1 %v1275_v18  ;;  %v155_v34 = vld [vmem:[%s2372_s0 + $0x160] sm:$0xff]  ;;  %v389_v36 = vld [vmem:[%s2371_s4 + $0xa8] sm:$0xff] }
   0xb   :  { %36 = vst [vmem:[#allocation2 + $0x50] sm:$0xff] %v1273_v17  ;;  %37 = vst [vmem:[#allocation2 + $0x58] sm:$0xff] %v1273_v17  ;;  %v391_v37 = vld [vmem:[%s2371_s4 + $0xb8] sm:$0xff]  ;;  %v113_v38 = vld [vmem:[%s2372_s0 + $0x10] sm:$0xff] }
   0xc   :  { %38 = vst [vmem:[#allocation2 + $0x60] sm:$0xff] %v1273_v17  ;;  %39 = vst [vmem:[#allocation2 + $0x68] sm:$0xff] %v1273_v17  ;;  %v156_v39 = vld [vmem:[%s2372_s0 + $0x168] sm:$0xff]  ;;  %v114_v40 = vld [vmem:[%s2372_s0 + $0x18] sm:$0xff]  ;;  %v1173_v58 = vpack.c.bf16 %v391_v37, %v389_v36 }
   0xd   :  { %40 = vst [vmem:[#allocation2 + $0x70] sm:$0xff] %v1273_v17  ;;  %41 = vst [vmem:[#allocation2 + $0x78] sm:$0xff] %v1273_v17  ;;  %1164 = vmatpush1.bf16.msra.mxu0 %v1163_v23  ;;  %1195 = vmatpush1.bf16.msra.mxu1 %v1163_v23  ;;  %v157_v42 = vld [vmem:[%s2372_s0 + $0x170] sm:$0xff]  ;;  %v115_v43 = vld [vmem:[%s2372_s0 + $0x20] sm:$0xff] }
   0xe   :  { %42 = vst [vmem:[#allocation2 + $0x80] sm:$0xff] %v1273_v17  ;;  %43 = vst [vmem:[#allocation2 + $0x88] sm:$0xff] %v1273_v17  ;;  %1166 = vmatprep.subr.bf16.mxu0 %v1165_v24  ;;  %1188 = vmatprep.subr.bf16.mxu1 %v1165_v24  ;;  %v158_v44 = vld [vmem:[%s2372_s0 + $0x178] sm:$0xff]  ;;  %v116_v45 = vld [vmem:[%s2372_s0 + $0x28] sm:$0xff] }
   0xf   :  { %44 = vst [vmem:[#allocation2 + $0x90] sm:$0xff] %v1273_v17  ;;  %45 = vst [vmem:[#allocation2 + $0x98] sm:$0xff] %v1273_v17  ;;  %v159_v46 = vld [vmem:[%s2372_s0 + $0x180] sm:$0xff]  ;;  %v117_v47 = vld [vmem:[%s2372_s0 + $0x30] sm:$0xff] }
  0x10   :  { %46 = vst [vmem:[#allocation2 + $0xa0] sm:$0xff] %v1273_v17  ;;  %47 = vst [vmem:[#allocation2 + $0xa8] sm:$0xff] %v1273_v17  ;;  %v388_v48 = vld [vmem:[%s2371_s4 + $0xa0] sm:$0xff]  ;;  %v390_v49 = vld [vmem:[%s2371_s4 + $0xb0] sm:$0xff] }
  0x11   :  { %48 = vst [vmem:[#allocation2 + $0xb0] sm:$0xff] %v1273_v17  ;;  %49 = vst [vmem:[#allocation2 + $0xb8] sm:$0xff] %v1273_v17  ;;  %v160_v50 = vld [vmem:[%s2372_s0 + $0x188] sm:$0xff]  ;;  %v118_v51 = vld [vmem:[%s2372_s0 + $0x38] sm:$0xff]  ;;  %1168 = vmatpush1.bf16.msra.mxu0 %v1167_v35  ;;  %1196 = vmatpush1.bf16.msra.mxu1 %v1167_v35  ;;  %v1175_v1 = vpack.c.bf16 %v390_v49, %v388_v48 }
  0x12   :  { %50 = vst [vmem:[#allocation2 + $0xc0] sm:$0xff] %v1273_v17  ;;  %51 = vst [vmem:[#allocation2 + $0xc8] sm:$0xff] %v1273_v17  ;;  %v161_v52 = vld [vmem:[%s2372_s0 + $0x190] sm:$0xff]  ;;  %v393_v54 = vld [vmem:[%s2371_s4 + $0xc8] sm:$0xff]  ;;  %1170 = vmatprep.subr.bf16.mxu0 %v1169_v41  ;;  %1189 = vmatprep.subr.bf16.mxu1 %v1169_v41 }
  0x13   :  { %52 = vst [vmem:[#allocation2 + $0xd0] sm:$0xff] %v1273_v17  ;;  %53 = vst [vmem:[#allocation2 + $0xd8] sm:$0xff] %v1273_v17  ;;  %v119_v55 = vld [vmem:[%s2372_s0 + $0x40] sm:$0xff]  ;;  %v162_v56 = vld [vmem:[%s2372_s0 + $0x198] sm:$0xff] }
  0x14   :  { %54 = vst [vmem:[#allocation2 + $0xe0] sm:$0xff] %v1273_v17  ;;  %55 = vst [vmem:[#allocation2 + $0xe8] sm:$0xff] %v1273_v17  ;;  %v120_v57 = vld [vmem:[%s2372_s0 + $0x48] sm:$0xff]  ;;  %v163_v59 = vld [vmem:[%s2372_s0 + $0x1a0] sm:$0xff] }
  0x15   :  { %56 = vst [vmem:[#allocation2 + $0xf0] sm:$0xff] %v1273_v17  ;;  %57 = vst [vmem:[#allocation2 + $0xf8] sm:$0xff] %v1273_v17  ;;  %v121_v60 = vld [vmem:[%s2372_s0 + $0x50] sm:$0xff]  ;;  %v164_v61 = vld [vmem:[%s2372_s0 + $0x1a8] sm:$0xff]  ;;  %1172 = vmatpush1.bf16.msra.mxu0 %v1171_v53  ;;  %1197 = vmatpush1.bf16.msra.mxu1 %v1171_v53 }
  0x16   :  { %58 = vst [vmem:[#allocation2 + $0x100] sm:$0xff] %v1273_v17  ;;  %59 = vst [vmem:[#allocation2 + $0x108] sm:$0xff] %v1273_v17  ;;  %v395_v62 = vld [vmem:[%s2371_s4 + $0xd8] sm:$0xff]  ;;  %v165_v0 = vld [vmem:[%s2372_s0 + $0x1b0] sm:$0xff]  ;;  %1174 = vmatprep.subr.bf16.mxu0 %v1173_v58  ;;  %1190 = vmatprep.subr.bf16.mxu1 %v1173_v58 }
  0x17   :  { %60 = vst [vmem:[#allocation2 + $0x110] sm:$0xff] %v1273_v17  ;;  %61 = vst [vmem:[#allocation2 + $0x118] sm:$0xff] %v1273_v17  ;;  %v122_v63 = vld [vmem:[%s2372_s0 + $0x58] sm:$0xff]  ;;  %v1177_v2 = vpack.c.bf16 %v395_v62, %v393_v54  ;;  %v392_v3 = vld [vmem:[%s2371_s4 + $0xc0] sm:$0xff] }
  0x18   :  { %62 = vst [vmem:[#allocation2 + $0x120] sm:$0xff] %v1273_v17  ;;  %63 = vst [vmem:[#allocation2 + $0x128] sm:$0xff] %v1273_v17  ;;  %v394_v5 = vld [vmem:[%s2371_s4 + $0xd0] sm:$0xff]  ;;  %v397_v6 = vld [vmem:[%s2371_s4 + $0xe8] sm:$0xff] }
  0x19   :  { %64 = vst [vmem:[#allocation2 + $0x130] sm:$0xff] %v1273_v17  ;;  %65 = vst [vmem:[#allocation2 + $0x138] sm:$0xff] %v1273_v17  ;;  %v399_v7 = vld [vmem:[%s2371_s4 + $0xf8] sm:$0xff]  ;;  %1176 = vmatpush1.bf16.msra.mxu0 %v1175_v1  ;;  %1198 = vmatpush1.bf16.msra.mxu1 %v1175_v1  ;;  %v1179_v8 = vpack.c.bf16 %v394_v5, %v392_v3  ;;  %v396_v10 = vld [vmem:[%s2371_s4 + $0xe0] sm:$0xff] }
  0x1a   :  { %66 = vst [vmem:[#allocation2 + $0x140] sm:$0xff] %v1273_v17  ;;  %67 = vst [vmem:[#allocation2 + $0x148] sm:$0xff] %v1273_v17  ;;  %1178 = vmatprep.subr.bf16.mxu0 %v1177_v2  ;;  %1191 = vmatprep.subr.bf16.mxu1 %v1177_v2  ;;  %v1181_v9 = vpack.c.bf16 %v399_v7, %v397_v6  ;;  %v398_v11 = vld [vmem:[%s2371_s4 + $0xf0] sm:$0xff]  ;;  %v123_v12 = vld [vmem:[%s2372_s0 + $0x60] sm:$0xff] }
  0x1b   :  { %68 = vst [vmem:[#allocation2 + $0x150] sm:$0xff] %v1273_v17  ;;  %69 = vst [vmem:[#allocation2 + $0x158] sm:$0xff] %v1273_v17  ;;  %v166_v13 = vld [vmem:[%s2372_s0 + $0x1b8] sm:$0xff]  ;;  %v124_v14 = vld [vmem:[%s2372_s0 + $0x68] sm:$0xff]  ;;  %v1183_v16 = vpack.c.bf16 %v398_v11, %v396_v10 }
  0x1c   :  { %70 = vst [vmem:[#allocation2 + $0x160] sm:$0xff] %v1273_v17  ;;  %71 = vst [vmem:[#allocation2 + $0x168] sm:$0xff] %v1273_v17  ;;  %v167_v15 = vld [vmem:[%s2372_s0 + $0x1c0] sm:$0xff]  ;;  %v168_v18 = vld [vmem:[%s2372_s0 + $0x1c8] sm:$0xff] }
  0x1d   :  { %72 = vst [vmem:[#allocation2 + $0x170] sm:$0xff] %v1273_v17  ;;  %73 = vst [vmem:[#allocation2 + $0x178] sm:$0xff] %v1273_v17  ;;  %1180 = vmatpush1.bf16.msra.mxu0 %v1179_v8  ;;  %1199 = vmatpush1.bf16.msra.mxu1 %v1179_v8  ;;  %v126_v19 = vld [vmem:[%s2372_s0 + $0x78] sm:$0xff]  ;;  %v169_v20 = vld [vmem:[%s2372_s0 + $0x1d0] sm:$0xff] }
  0x1e   :  { %74 = vst [vmem:[#allocation2 + $0x180] sm:$0xff] %v1273_v17  ;;  %75 = vst [vmem:[#allocation2 + $0x188] sm:$0xff] %v1273_v17  ;;  %1182 = vmatprep.subr.bf16.mxu0 %v1181_v9  ;;  %1192 = vmatprep.subr.bf16.mxu1 %v1181_v9  ;;  %v127_v21 = vld [vmem:[%s2372_s0 + $0x80] sm:$0xff]  ;;  %v170_v22 = vld [vmem:[%s2372_s0 + $0x1d8] sm:$0xff] }
  0x1f   :  { %76 = vst [vmem:[#allocation2 + $0x190] sm:$0xff] %v1273_v17  ;;  %77 = vst [vmem:[#allocation2 + $0x198] sm:$0xff] %v1273_v17  ;;  %v128_v25 = vld [vmem:[%s2372_s0 + $0x88] sm:$0xff]  ;;  %v171_v26 = vld [vmem:[%s2372_s0 + $0x1e0] sm:$0xff] }
  0x20   :  { %78 = vst [vmem:[#allocation2 + $0x1a0] sm:$0xff] %v1273_v17  ;;  %79 = vst [vmem:[#allocation2 + $0x1a8] sm:$0xff] %v1273_v17  ;;  %v129_v27 = vld [vmem:[%s2372_s0 + $0x90] sm:$0xff]  ;;  %v172_v28 = vld [vmem:[%s2372_s0 + $0x1e8] sm:$0xff] }
  0x21   :  { %80 = vst [vmem:[#allocation2 + $0x1b0] sm:$0xff] %v1273_v17  ;;  %81 = vst [vmem:[#allocation2 + $0x1b8] sm:$0xff] %v1273_v17  ;;  %v173_v30 = vld [vmem:[%s2372_s0 + $0x1f0] sm:$0xff]  ;;  %1184 = vmatpush1.bf16.msra.mxu0 %v1183_v16  ;;  %1200 = vmatpush1.bf16.msra.mxu1 %v1183_v16  ;;  %v131_v31 = vld [vmem:[%s2372_s0 + $0xa0] sm:$0xff] }
  0x22   :  { %82 = vst [vmem:[#allocation2 + $0x1c0] sm:$0xff] %v1273_v17  ;;  %83 = vst [vmem:[#allocation2 + $0x1c8] sm:$0xff] %v1273_v17  ;;  %v133_v35 = vld [vmem:[%s2372_s0 + $0xb0] sm:$0xff]  ;;  %v241_v36 = vld [vmem:[%s2373_s1 + $0x8] sm:$0xff] }
  0x23   :  { %84 = vst [vmem:[#allocation2 + $0x1d0] sm:$0xff] %v1273_v17  ;;  %85 = vst [vmem:[#allocation2 + $0x1d8] sm:$0xff] %v1273_v17  ;;  %v134_v37 = vld [vmem:[%s2372_s0 + $0xb8] sm:$0xff]  ;;  %v244_v48 = vld [vmem:[%s2373_s1 + $0x20] sm:$0xff] }
  0x24   :  { %86 = vst [vmem:[#allocation2 + $0x1e0] sm:$0xff] %v1273_v17  ;;  %87 = vst [vmem:[#allocation2 + $0x1e8] sm:$0xff] %v1273_v17  ;;  %v137_v49 = vld [vmem:[%s2372_s0 + $0xd0] sm:$0xff]  ;;  %v139_v53 = vld [vmem:[%s2372_s0 + $0xe0] sm:$0xff] }
  0x25   :  { %88 = vst [vmem:[#allocation2 + $0x1f0] sm:$0xff] %v1273_v17  ;;  %89 = vst [vmem:[#allocation2 + $0x1f8] sm:$0xff] %v1273_v17  ;;  %v247_v54 = vld [vmem:[%s2373_s1 + $0x38] sm:$0xff]  ;;  %v248_v58 = vld [vmem:[%s2373_s1 + $0x40] sm:$0xff] }
  0x26   :  { %90 = vst [vmem:[#allocation2 + $0x200] sm:$0xff] %v1273_v17  ;;  %91 = vst [vmem:[#allocation2 + $0x208] sm:$0xff] %v1273_v17  ;;  %v250_v62 = vld [vmem:[%s2373_s1 + $0x50] sm:$0xff]  ;;  %v144_v1 = vld [vmem:[%s2372_s0 + $0x108] sm:$0xff] }
  0x27   :  { %92 = vst [vmem:[#allocation2 + $0x210] sm:$0xff] %v1273_v17  ;;  %93 = vst [vmem:[#allocation2 + $0x218] sm:$0xff] %v1273_v17  ;;  %v252_v2 = vld [vmem:[%s2373_s1 + $0x60] sm:$0xff]  ;;  %v145_v3 = vld [vmem:[%s2372_s0 + $0x110] sm:$0xff] }
  0x28   :  { %94 = vst [vmem:[#allocation2 + $0x220] sm:$0xff] %v1273_v17  ;;  %95 = vst [vmem:[#allocation2 + $0x228] sm:$0xff] %v1273_v17  ;;  %v253_v5 = vld [vmem:[%s2373_s1 + $0x68] sm:$0xff]  ;;  %v146_v6 = vld [vmem:[%s2372_s0 + $0x118] sm:$0xff] }
  0x29   :  { %96 = vst [vmem:[#allocation2 + $0x230] sm:$0xff] %v1273_v17  ;;  %97 = vst [vmem:[#allocation2 + $0x238] sm:$0xff] %v1273_v17  ;;  %v254_v7 = vld [vmem:[%s2373_s1 + $0x70] sm:$0xff]  ;;  %v148_v16 = vld [vmem:[%s2372_s0 + $0x128] sm:$0xff] }
  0x2a   :  { %98 = vst [vmem:[#allocation2 + $0x240] sm:$0xff] %v1273_v17  ;;  %99 = vst [vmem:[#allocation2 + $0x248] sm:$0xff] %v1273_v17 }
  0x2b   :  { %100 = vst [vmem:[#allocation2 + $0x250] sm:$0xff] %v1273_v17  ;;  %101 = vst [vmem:[#allocation2 + $0x258] sm:$0xff] %v1273_v17 }
  0x2c   :  { %102 = vst [vmem:[#allocation2 + $0x260] sm:$0xff] %v1273_v17  ;;  %103 = vst [vmem:[#allocation2 + $0x268] sm:$0xff] %v1273_v17 }
  0x2d   :  { %104 = vst [vmem:[#allocation2 + $0x270] sm:$0xff] %v1273_v17  ;;  %105 = vst [vmem:[#allocation2 + $0x278] sm:$0xff] %v1273_v17 }
  0x2e   :  { %106 = vst [vmem:[#allocation2 + $0x280] sm:$0xff] %v1273_v17  ;;  %107 = vst [vmem:[#allocation2 + $0x288] sm:$0xff] %v1273_v17 }
  0x2f   :  { %108 = vst [vmem:[#allocation2 + $0x290] sm:$0xff] %v1273_v17  ;;  %109 = vst [vmem:[#allocation2 + $0x298] sm:$0xff] %v1273_v17 }
  0x30   :  { %110 = vst [vmem:[#allocation2 + $0x2a0] sm:$0xff] %v1273_v17  ;;  %176 = vst.msk [vmem:[#allocation2] sm:$0xff] %vm175_vm1, %v111_v29  ;;  %v125_v17 = vld [vmem:[%s2372_s0 + $0x70] sm:$0xff]  ;;  %v130_v29 = vld [vmem:[%s2372_s0 + $0x98] sm:$0xff] }
  0x31   :  { %219 = vst.msk [vmem:[#allocation2 + $0x158] sm:$0xff] %vm175_vm1, %v154_v32  ;;  %177 = vst.msk [vmem:[#allocation2 + $0x8] sm:$0xff] %vm175_vm1, %v112_v33  ;;  %v174_v32 = vld [vmem:[%s2372_s0 + $0x1f8] sm:$0xff]  ;;  %v132_v33 = vld [vmem:[%s2372_s0 + $0xa8] sm:$0xff] }
  0x32   :  { %220 = vst.msk [vmem:[#allocation2 + $0x160] sm:$0xff] %vm175_vm1, %v155_v34  ;;  %178 = vst.msk [vmem:[#allocation2 + $0x10] sm:$0xff] %vm175_vm1, %v113_v38  ;;  %v240_v34 = vld [vmem:[%s2373_s1] sm:$0xff]  ;;  %v242_v38 = vld [vmem:[%s2373_s1 + $0x10] sm:$0xff] }
  0x33   :  { %221 = vst.msk [vmem:[#allocation2 + $0x168] sm:$0xff] %vm175_vm1, %v156_v39  ;;  %179 = vst.msk [vmem:[#allocation2 + $0x18] sm:$0xff] %vm175_vm1, %v114_v40 }
  0x34   :  { %222 = vst.msk [vmem:[#allocation2 + $0x170] sm:$0xff] %vm175_vm1, %v157_v42  ;;  %180 = vst.msk [vmem:[#allocation2 + $0x20] sm:$0xff] %vm175_vm1, %v115_v43 }
  0x35   :  { %223 = vst.msk [vmem:[#allocation2 + $0x178] sm:$0xff] %vm175_vm1, %v158_v44  ;;  %181 = vst.msk [vmem:[#allocation2 + $0x28] sm:$0xff] %vm175_vm1, %v116_v45  ;;  %v135_v45 = vld [vmem:[%s2372_s0 + $0xc0] sm:$0xff] }
  0x36   :  { %224 = vst.msk [vmem:[#allocation2 + $0x180] sm:$0xff] %vm175_vm1, %v159_v46  ;;  %182 = vst.msk [vmem:[#allocation2 + $0x30] sm:$0xff] %vm175_vm1, %v117_v47  ;;  %v243_v46 = vld [vmem:[%s2373_s1 + $0x18] sm:$0xff]  ;;  %v136_v47 = vld [vmem:[%s2372_s0 + $0xc8] sm:$0xff] }
  0x37   :  { %225 = vst.msk [vmem:[#allocation2 + $0x188] sm:$0xff] %vm175_vm1, %v160_v50  ;;  %183 = vst.msk [vmem:[#allocation2 + $0x38] sm:$0xff] %vm175_vm1, %v118_v51  ;;  %v283_v23 = vld [vmem:[#allocation2] sm:$0xff]  ;;  %v245_v50 = vld [vmem:[%s2373_s1 + $0x28] sm:$0xff] }
  0x38   :  { %226 = vst.msk [vmem:[#allocation2 + $0x190] sm:$0xff] %vm175_vm1, %v161_v52  ;;  %184 = vst.msk [vmem:[#allocation2 + $0x40] sm:$0xff] %vm175_vm1, %v119_v55  ;;  %v326_v24 = vld [vmem:[#allocation2 + $0x158] sm:$0xff]  ;;  %465 = vmatmul.mubr.f32.vlgmr.msra.gmra.mrb[0].mxu0 %v283_v23  ;;  %v284_v39 = vld [vmem:[#allocation2 + $0x8] sm:$0xff] }
  0x39   :  { %227 = vst.msk [vmem:[#allocation2 + $0x198] sm:$0xff] %vm175_vm1, %v162_v56  ;;  %185 = vst.msk [vmem:[#allocation2 + $0x48] sm:$0xff] %vm175_vm1, %v120_v57  ;;  %723 = vmatmul.mubr.f32.vlgmr.msra.gmra.mrb[0].mxu1 %v326_v24  ;;  %470 = vmatprep.mubr.f32.mxu0 %v1202_v4  ;;  %v327_v40 = vld [vmem:[#allocation2 + $0x160] sm:$0xff]  ;;  %v285_v41 = vld [vmem:[#allocation2 + $0x10] sm:$0xff] }
  0x3a   :  { %228 = vst.msk [vmem:[#allocation2 + $0x1a0] sm:$0xff] %vm175_vm1, %v163_v59  ;;  %186 = vst.msk [vmem:[#allocation2 + $0x50] sm:$0xff] %vm175_vm1, %v121_v60  ;;  %728 = vmatprep.mubr.f32.mxu1 %v1202_v4  ;;  %v328_v42 = vld [vmem:[#allocation2 + $0x168] sm:$0xff]  ;;  %v286_v43 = vld [vmem:[#allocation2 + $0x18] sm:$0xff] }
  0x3b   :  { %229 = vst.msk [vmem:[#allocation2 + $0x1a8] sm:$0xff] %vm175_vm1, %v164_v61  ;;  %187 = vst.msk [vmem:[#allocation2 + $0x58] sm:$0xff] %vm175_vm1, %v122_v63  ;;  %v329_v44 = vld [vmem:[#allocation2 + $0x170] sm:$0xff]  ;;  %v138_v51 = vld [vmem:[%s2372_s0 + $0xd8] sm:$0xff] }
  0x3c   :  { %230 = vst.msk [vmem:[#allocation2 + $0x1b0] sm:$0xff] %vm175_vm1, %v165_v0  ;;  %188 = vst.msk [vmem:[#allocation2 + $0x60] sm:$0xff] %vm175_vm1, %v123_v12  ;;  %471 = vmatmul.mubr.f32.gmra.mrb[2].mxu0 %v284_v39  ;;  %v246_v52 = vld [vmem:[%s2373_s1 + $0x30] sm:$0xff]  ;;  %v287_v55 = vld [vmem:[#allocation2 + $0x20] sm:$0xff] }
  0x3d   :  { %231 = vst.msk [vmem:[#allocation2 + $0x1b8] sm:$0xff] %vm175_vm1, %v166_v13  ;;  %189 = vst.msk [vmem:[#allocation2 + $0x68] sm:$0xff] %vm175_vm1, %v124_v14  ;;  %729 = vmatmul.mubr.f32.gmra.mrb[2].mxu1 %v327_v40  ;;  %476 = vmatprep.mubr.f32.mxu0 %v1202_v4  ;;  %v330_v56 = vld [vmem:[#allocation2 + $0x178] sm:$0xff]  ;;  %v140_v57 = vld [vmem:[%s2372_s0 + $0xe8] sm:$0xff] }
  0x3e   :  { %232 = vst.msk [vmem:[#allocation2 + $0x1c0] sm:$0xff] %vm175_vm1, %v167_v15  ;;  %190 = vst.msk [vmem:[#allocation2 + $0x70] sm:$0xff] %vm175_vm1, %v125_v17  ;;  %734 = vmatprep.mubr.f32.mxu1 %v1202_v4  ;;  %v141_v59 = vld [vmem:[%s2372_s0 + $0xf0] sm:$0xff]  ;;  %v249_v60 = vld [vmem:[%s2373_s1 + $0x48] sm:$0xff] }
  0x3f   :  { %233 = vst.msk [vmem:[#allocation2 + $0x1c8] sm:$0xff] %vm175_vm1, %v168_v18  ;;  %191 = vst.msk [vmem:[#allocation2 + $0x78] sm:$0xff] %vm175_vm1, %v126_v19  ;;  %v142_v61 = vld [vmem:[%s2372_s0 + $0xf8] sm:$0xff]  ;;  %v143_v63 = vld [vmem:[%s2372_s0 + $0x100] sm:$0xff] }
  0x40   :  { %234 = vst.msk [vmem:[#allocation2 + $0x1d0] sm:$0xff] %vm175_vm1, %v169_v20  ;;  %192 = vst.msk [vmem:[#allocation2 + $0x80] sm:$0xff] %vm175_vm1, %v127_v21  ;;  %477 = vmatmul.mubr.f32.gmra.mrb[4].mxu0 %v285_v41  ;;  %v251_v0 = vld [vmem:[%s2373_s1 + $0x58] sm:$0xff]  ;;  %v288_v8 = vld [vmem:[#allocation2 + $0x28] sm:$0xff] }
  0x41   :  { %235 = vst.msk [vmem:[#allocation2 + $0x1d8] sm:$0xff] %vm175_vm1, %v170_v22  ;;  %193 = vst.msk [vmem:[#allocation2 + $0x88] sm:$0xff] %vm175_vm1, %v128_v25  ;;  %735 = vmatmul.mubr.f32.gmra.mrb[4].mxu1 %v328_v42  ;;  %482 = vmatprep.mubr.f32.mxu0 %v1202_v4  ;;  %v331_v9 = vld [vmem:[#allocation2 + $0x180] sm:$0xff]  ;;  %v289_v10 = vld [vmem:[#allocation2 + $0x30] sm:$0xff] }
  0x42   :  { %236 = vst.msk [vmem:[#allocation2 + $0x1e0] sm:$0xff] %vm175_vm1, %v171_v26  ;;  %194 = vst.msk [vmem:[#allocation2 + $0x90] sm:$0xff] %vm175_vm1, %v129_v27  ;;  %740 = vmatprep.mubr.f32.mxu1 %v1202_v4  ;;  %v332_v11 = vld [vmem:[#allocation2 + $0x188] sm:$0xff]  ;;  %v290_v12 = vld [vmem:[#allocation2 + $0x38] sm:$0xff] }
  0x43   :  { %237 = vst.msk [vmem:[#allocation2 + $0x1e8] sm:$0xff] %vm175_vm1, %v172_v28  ;;  %195 = vst.msk [vmem:[#allocation2 + $0x98] sm:$0xff] %vm175_vm1, %v130_v29  ;;  %v333_v13 = vld [vmem:[#allocation2 + $0x190] sm:$0xff]  ;;  %v147_v14 = vld [vmem:[%s2372_s0 + $0x120] sm:$0xff] }
  0x44   :  { %238 = vst.msk [vmem:[#allocation2 + $0x1f0] sm:$0xff] %vm175_vm1, %v173_v30  ;;  %196 = vst.msk [vmem:[#allocation2 + $0xa0] sm:$0xff] %vm175_vm1, %v131_v31  ;;  %483 = vmatmul.mubr.f32.gmra.mrb[6].mxu0 %v286_v43  ;;  %v255_v15 = vld [vmem:[%s2373_s1 + $0x78] sm:$0xff]  ;;  %v273_v17 = vld [vmem:[%s2374_s2] sm:$0xff] }
  0x45   :  { %239 = vst.msk [vmem:[#allocation2 + $0x1f8] sm:$0xff] %vm175_vm1, %v174_v32  ;;  %197 = vst.msk [vmem:[#allocation2 + $0xa8] sm:$0xff] %vm175_vm1, %v132_v33  ;;  %741 = vmatmul.mubr.f32.gmra.mrb[6].mxu1 %v329_v44  ;;  %488 = vmatprep.mubr.f32.mxu0 %v1202_v4  ;;  %v149_v18 = vld [vmem:[%s2372_s0 + $0x130] sm:$0xff]  ;;  %v274_v19 = vld [vmem:[%s2374_s2 + $0x8] sm:$0xff] }
  0x46   :  { %257 = vst.msk [vmem:[#allocation2 + $0x200] sm:$0xff] %vm256_vm2, %v240_v34  ;;  %258 = vst.msk [vmem:[#allocation2 + $0x208] sm:$0xff] %vm256_vm2, %v241_v36  ;;  %746 = vmatprep.mubr.f32.mxu1 %v1202_v4  ;;  %v150_v20 = vld [vmem:[%s2372_s0 + $0x138] sm:$0xff]  ;;  %v275_v21 = vld [vmem:[%s2374_s2 + $0x10] sm:$0xff] }
  0x47   :  { %198 = vst.msk [vmem:[#allocation2 + $0xb0] sm:$0xff] %vm175_vm1, %v133_v35  ;;  %199 = vst.msk [vmem:[#allocation2 + $0xb8] sm:$0xff] %vm175_vm1, %v134_v37  ;;  %v151_v22 = vld [vmem:[%s2372_s0 + $0x140] sm:$0xff]  ;;  %v276_v23 = vld [vmem:[%s2374_s2 + $0x18] sm:$0xff] }
  0x48   :  { %259 = vst.msk [vmem:[#allocation2 + $0x210] sm:$0xff] %vm256_vm2, %v242_v38  ;;  %260 = vst.msk [vmem:[#allocation2 + $0x218] sm:$0xff] %vm256_vm2, %v243_v46  ;;  %489 = vmatmul.mubr.f32.gmra.mrb[8].mxu0 %v287_v55  ;;  %v152_v24 = vld [vmem:[%s2372_s0 + $0x148] sm:$0xff]  ;;  %v291_v25 = vld [vmem:[#allocation2 + $0x40] sm:$0xff] }
  0x49   :  { %200 = vst.msk [vmem:[#allocation2 + $0xc0] sm:$0xff] %vm175_vm1, %v135_v45  ;;  %201 = vst.msk [vmem:[#allocation2 + $0xc8] sm:$0xff] %vm175_vm1, %v136_v47  ;;  %747 = vmatmul.mubr.f32.gmra.mrb[8].mxu1 %v330_v56  ;;  %494 = vmatprep.mubr.f32.mxu0 %v1202_v4  ;;  %v334_v26 = vld [vmem:[#allocation2 + $0x198] sm:$0xff]  ;;  %v281_v27 = vld [vmem:[%s2375_s3] sm:$0xff] }
  0x4a   :  { %261 = vst.msk [vmem:[#allocation2 + $0x220] sm:$0xff] %vm256_vm2, %v244_v48  ;;  %262 = vst.msk [vmem:[#allocation2 + $0x228] sm:$0xff] %vm256_vm2, %v245_v50  ;;  %752 = vmatprep.mubr.f32.mxu1 %v1202_v4  ;;  %v153_v28 = vld [vmem:[%s2372_s0 + $0x150] sm:$0xff]  ;;  %v292_v29 = vld [vmem:[#allocation2 + $0x48] sm:$0xff] }
  0x4b   :  { %202 = vst.msk [vmem:[#allocation2 + $0xd0] sm:$0xff] %vm175_vm1, %v137_v49  ;;  %203 = vst.msk [vmem:[#allocation2 + $0xd8] sm:$0xff] %vm175_vm1, %v138_v51  ;;  %v335_v30 = vld [vmem:[#allocation2 + $0x1a0] sm:$0xff]  ;;  %v293_v31 = vld [vmem:[#allocation2 + $0x50] sm:$0xff] }
  0x4c   :  { %263 = vst.msk [vmem:[#allocation2 + $0x230] sm:$0xff] %vm256_vm2, %v246_v52  ;;  %264 = vst.msk [vmem:[#allocation2 + $0x238] sm:$0xff] %vm256_vm2, %v247_v54  ;;  %495 = vmatmul.mubr.f32.gmra.mrb[10].mxu0 %v288_v8  ;;  %v336_v32 = vld [vmem:[#allocation2 + $0x1a8] sm:$0xff]  ;;  %v294_v33 = vld [vmem:[#allocation2 + $0x58] sm:$0xff] }
  0x4d   :  { %204 = vst.msk [vmem:[#allocation2 + $0xe0] sm:$0xff] %vm175_vm1, %v139_v53  ;;  %205 = vst.msk [vmem:[#allocation2 + $0xe8] sm:$0xff] %vm175_vm1, %v140_v57  ;;  %753 = vmatmul.mubr.f32.gmra.mrb[10].mxu1 %v331_v9  ;;  %500 = vmatprep.mubr.f32.mxu0 %v1202_v4  ;;  %v337_v34 = vld [vmem:[#allocation2 + $0x1b0] sm:$0xff]  ;;  %v295_v35 = vld [vmem:[#allocation2 + $0x60] sm:$0xff] }
  0x4e   :  { %265 = vst.msk [vmem:[#allocation2 + $0x240] sm:$0xff] %vm256_vm2, %v248_v58  ;;  %266 = vst.msk [vmem:[#allocation2 + $0x248] sm:$0xff] %vm256_vm2, %v249_v60  ;;  %758 = vmatprep.mubr.f32.mxu1 %v1202_v4  ;;  %v338_v36 = vld [vmem:[#allocation2 + $0x1b8] sm:$0xff]  ;;  %v296_v37 = vld [vmem:[#allocation2 + $0x68] sm:$0xff] }
  0x4f   :  { %206 = vst.msk [vmem:[#allocation2 + $0xf0] sm:$0xff] %vm175_vm1, %v141_v59  ;;  %207 = vst.msk [vmem:[#allocation2 + $0xf8] sm:$0xff] %vm175_vm1, %v142_v61  ;;  %v339_v38 = vld [vmem:[#allocation2 + $0x1c0] sm:$0xff]  ;;  %v297_v39 = vld [vmem:[#allocation2 + $0x70] sm:$0xff] }
  0x50   :  { %267 = vst.msk [vmem:[#allocation2 + $0x250] sm:$0xff] %vm256_vm2, %v250_v62  ;;  %268 = vst.msk [vmem:[#allocation2 + $0x258] sm:$0xff] %vm256_vm2, %v251_v0  ;;  %501 = vmatmul.mubr.f32.gmra.mrb[12].mxu0 %v289_v10  ;;  %v340_v40 = vld [vmem:[#allocation2 + $0x1c8] sm:$0xff]  ;;  %v298_v41 = vld [vmem:[#allocation2 + $0x78] sm:$0xff] }
  0x51   :  { %208 = vst.msk [vmem:[#allocation2 + $0x100] sm:$0xff] %vm175_vm1, %v143_v63  ;;  %209 = vst.msk [vmem:[#allocation2 + $0x108] sm:$0xff] %vm175_vm1, %v144_v1  ;;  %759 = vmatmul.mubr.f32.gmra.mrb[12].mxu1 %v332_v11  ;;  %506 = vmatprep.mubr.f32.mxu0 %v1202_v4  ;;  %v341_v42 = vld [vmem:[#allocation2 + $0x1d0] sm:$0xff]  ;;  %v299_v43 = vld [vmem:[#allocation2 + $0x80] sm:$0xff] }
  0x52   :  { %269 = vst.msk [vmem:[#allocation2 + $0x260] sm:$0xff] %vm256_vm2, %v252_v2  ;;  %270 = vst.msk [vmem:[#allocation2 + $0x268] sm:$0xff] %vm256_vm2, %v253_v5  ;;  %764 = vmatprep.mubr.f32.mxu1 %v1202_v4  ;;  %v342_v44 = vld [vmem:[#allocation2 + $0x1d8] sm:$0xff]  ;;  %v300_v45 = vld [vmem:[#allocation2 + $0x88] sm:$0xff] }
  0x53   :  { %210 = vst.msk [vmem:[#allocation2 + $0x110] sm:$0xff] %vm175_vm1, %v145_v3  ;;  %211 = vst.msk [vmem:[#allocation2 + $0x118] sm:$0xff] %vm175_vm1, %v146_v6  ;;  %v343_v46 = vld [vmem:[#allocation2 + $0x1e0] sm:$0xff]  ;;  %v301_v47 = vld [vmem:[#allocation2 + $0x90] sm:$0xff] }
  0x54   :  { %271 = vst.msk [vmem:[#allocation2 + $0x270] sm:$0xff] %vm256_vm2, %v254_v7  ;;  %272 = vst.msk [vmem:[#allocation2 + $0x278] sm:$0xff] %vm256_vm2, %v255_v15  ;;  %507 = vmatmul.mubr.f32.gmra.mrb[14].mxu0 %v290_v12  ;;  %v344_v48 = vld [vmem:[#allocation2 + $0x1e8] sm:$0xff]  ;;  %v302_v49 = vld [vmem:[#allocation2 + $0x98] sm:$0xff] }
  0x55   :  { %212 = vst.msk [vmem:[#allocation2 + $0x120] sm:$0xff] %vm175_vm1, %v147_v14  ;;  %213 = vst.msk [vmem:[#allocation2 + $0x128] sm:$0xff] %vm175_vm1, %v148_v16  ;;  %765 = vmatmul.mubr.f32.gmra.mrb[14].mxu1 %v333_v13  ;;  %512 = vmatprep.mubr.f32.mxu0 %v1202_v4  ;;  %v345_v50 = vld [vmem:[#allocation2 + $0x1f0] sm:$0xff]  ;;  %v303_v51 = vld [vmem:[#allocation2 + $0xa0] sm:$0xff] }
  0x56   :  { %277 = vst.msk [vmem:[#allocation2 + $0x280] sm:$0xff] %vm256_vm2, %v273_v17  ;;  %278 = vst.msk [vmem:[#allocation2 + $0x288] sm:$0xff] %vm256_vm2, %v274_v19  ;;  %770 = vmatprep.mubr.f32.mxu1 %v1202_v4  ;;  %v346_v52 = vld [vmem:[#allocation2 + $0x1f8] sm:$0xff]  ;;  %v304_v53 = vld [vmem:[#allocation2 + $0xa8] sm:$0xff] }
  0x57   :  { %214 = vst.msk [vmem:[#allocation2 + $0x130] sm:$0xff] %vm175_vm1, %v149_v18  ;;  %215 = vst.msk [vmem:[#allocation2 + $0x138] sm:$0xff] %vm175_vm1, %v150_v20  ;;  %v347_v54 = vld [vmem:[#allocation2 + $0x200] sm:$0xff]  ;;  %v305_v55 = vld [vmem:[#allocation2 + $0xb0] sm:$0xff] }
  0x58   :  { %279 = vst.msk [vmem:[#allocation2 + $0x290] sm:$0xff] %vm256_vm2, %v275_v21  ;;  %280 = vst.msk [vmem:[#allocation2 + $0x298] sm:$0xff] %vm256_vm2, %v276_v23  ;;  %513 = vmatmul.mubr.f32.gmra.mrb[16].mxu0 %v291_v25  ;;  %v348_v56 = vld [vmem:[#allocation2 + $0x208] sm:$0xff]  ;;  %v306_v57 = vld [vmem:[#allocation2 + $0xb8] sm:$0xff] }
  0x59   :  { %216 = vst.msk [vmem:[#allocation2 + $0x140] sm:$0xff] %vm175_vm1, %v151_v22  ;;  %217 = vst.msk [vmem:[#allocation2 + $0x148] sm:$0xff] %vm175_vm1, %v152_v24  ;;  %771 = vmatmul.mubr.f32.gmra.mrb[16].mxu1 %v334_v26  ;;  %518 = vmatprep.mubr.f32.mxu0 %v1202_v4  ;;  %v349_v58 = vld [vmem:[#allocation2 + $0x210] sm:$0xff]  ;;  %v307_v59 = vld [vmem:[#allocation2 + $0xc0] sm:$0xff] }
  0x5a   :  { %282 = vst.msk [vmem:[#allocation2 + $0x2a0] sm:$0xff] %vm256_vm2, %v281_v27  ;;  %776 = vmatprep.mubr.f32.mxu1 %v1202_v4  ;;  %v350_v60 = vld [vmem:[#allocation2 + $0x218] sm:$0xff]  ;;  %v308_v61 = vld [vmem:[#allocation2 + $0xc8] sm:$0xff]  ;;  %v351_v62 = vld [vmem:[#allocation2 + $0x220] sm:$0xff] }
  0x5b   :  { %218 = vst.msk [vmem:[#allocation2 + $0x150] sm:$0xff] %vm175_vm1, %v153_v28  ;;  %v309_v63 = vld [vmem:[#allocation2 + $0xd0] sm:$0xff]  ;;  %v352_v0 = vld [vmem:[#allocation2 + $0x228] sm:$0xff]  ;;  %v310_v1 = vld [vmem:[#allocation2 + $0xd8] sm:$0xff] }
  0x5c   :  { %519 = vmatmul.mubr.f32.gmra.mrb[18].mxu0 %v292_v29  ;;  %v353_v2 = vld [vmem:[#allocation2 + $0x230] sm:$0xff]  ;;  %v311_v3 = vld [vmem:[#allocation2 + $0xe0] sm:$0xff]  ;;  %v354_v5 = vld [vmem:[#allocation2 + $0x238] sm:$0xff] }
  0x5d   :  { %777 = vmatmul.mubr.f32.gmra.mrb[18].mxu1 %v335_v30  ;;  %524 = vmatprep.mubr.f32.mxu0 %v1202_v4  ;;  %v312_v6 = vld [vmem:[#allocation2 + $0xe8] sm:$0xff]  ;;  %v355_v7 = vld [vmem:[#allocation2 + $0x240] sm:$0xff]  ;;  %v313_v8 = vld [vmem:[#allocation2 + $0xf0] sm:$0xff] }
  0x5e   :  { %782 = vmatprep.mubr.f32.mxu1 %v1202_v4  ;;  %v356_v9 = vld [vmem:[#allocation2 + $0x248] sm:$0xff]  ;;  %v314_v10 = vld [vmem:[#allocation2 + $0xf8] sm:$0xff]  ;;  %v357_v11 = vld [vmem:[#allocation2 + $0x250] sm:$0xff] }
  0x5f   :  { %v315_v12 = vld [vmem:[#allocation2 + $0x100] sm:$0xff]  ;;  %v358_v13 = vld [vmem:[#allocation2 + $0x258] sm:$0xff]  ;;  %v316_v14 = vld [vmem:[#allocation2 + $0x108] sm:$0xff] }
  0x60   :  { %525 = vmatmul.mubr.f32.gmra.mrb[20].mxu0 %v293_v31  ;;  %v359_v15 = vld [vmem:[#allocation2 + $0x260] sm:$0xff]  ;;  %v317_v16 = vld [vmem:[#allocation2 + $0x110] sm:$0xff]  ;;  %v360_v17 = vld [vmem:[#allocation2 + $0x268] sm:$0xff] }
  0x61   :  { %783 = vmatmul.mubr.f32.gmra.mrb[20].mxu1 %v336_v32  ;;  %530 = vmatprep.mubr.f32.mxu0 %v1202_v4  ;;  %v318_v18 = vld [vmem:[#allocation2 + $0x118] sm:$0xff]  ;;  %v361_v19 = vld [vmem:[#allocation2 + $0x270] sm:$0xff]  ;;  %v319_v20 = vld [vmem:[#allocation2 + $0x120] sm:$0xff] }
  0x62   :  { %788 = vmatprep.mubr.f32.mxu1 %v1202_v4  ;;  %v362_v21 = vld [vmem:[#allocation2 + $0x278] sm:$0xff]  ;;  %v320_v22 = vld [vmem:[#allocation2 + $0x128] sm:$0xff]  ;;  %v363_v23 = vld [vmem:[#allocation2 + $0x280] sm:$0xff] }
  0x63   :  { %v321_v24 = vld [vmem:[#allocation2 + $0x130] sm:$0xff]  ;;  %v364_v25 = vld [vmem:[#allocation2 + $0x288] sm:$0xff]  ;;  %v322_v26 = vld [vmem:[#allocation2 + $0x138] sm:$0xff] }
  0x64   :  { %531 = vmatmul.mubr.f32.gmra.mrb[22].mxu0 %v294_v33  ;;  %v365_v27 = vld [vmem:[#allocation2 + $0x290] sm:$0xff]  ;;  %v323_v28 = vld [vmem:[#allocation2 + $0x140] sm:$0xff]  ;;  %v366_v29 = vld [vmem:[#allocation2 + $0x298] sm:$0xff] }
  0x65   :  { %789 = vmatmul.mubr.f32.gmra.mrb[22].mxu1 %v337_v34  ;;  %536 = vmatprep.mubr.f32.mxu0 %v1202_v4  ;;  %v324_v30 = vld [vmem:[#allocation2 + $0x148] sm:$0xff]  ;;  %v367_v31 = vld [vmem:[#allocation2 + $0x2a0] sm:$0xff]  ;;  %v325_v32 = vld [vmem:[#allocation2 + $0x150] sm:$0xff] }
  0x66   :  { %794 = vmatprep.mubr.f32.mxu1 %v1202_v4 }
  0x68   :  { %537 = vmatmul.mubr.f32.gmra.mrb[24].mxu0 %v295_v35 }
  0x69   :  { %795 = vmatmul.mubr.f32.gmra.mrb[24].mxu1 %v338_v36  ;;  %542 = vmatprep.mubr.f32.mxu0 %v1202_v4 }
  0x6a   :  { %800 = vmatprep.mubr.f32.mxu1 %v1202_v4 }
  0x6c   :  { %543 = vmatmul.mubr.f32.gmra.mrb[26].mxu0 %v296_v37 }
  0x6d   :  { %801 = vmatmul.mubr.f32.gmra.mrb[26].mxu1 %v339_v38  ;;  %548 = vmatprep.mubr.f32.mxu0 %v1202_v4 }
  0x6e   :  { %806 = vmatprep.mubr.f32.mxu1 %v1202_v4 }
  0x70   :  { %549 = vmatmul.mubr.f32.gmra.mrb[28].mxu0 %v297_v39 }
  0x71   :  { %807 = vmatmul.mubr.f32.gmra.mrb[28].mxu1 %v340_v40  ;;  %554 = vmatprep.mubr.f32.mxu0 %v1202_v4 }
  0x72   :  { %812 = vmatprep.mubr.f32.mxu1 %v1202_v4 }
  0x74   :  { %555 = vmatmul.mubr.f32.gmra.mrb[30].mxu0 %v298_v41 }
  0x75   :  { %813 = vmatmul.mubr.f32.gmra.mrb[30].mxu1 %v341_v42  ;;  %560 = vmatprep.mubr.f32.mxu0 %v1202_v4 }
  0x76   :  { %818 = vmatprep.mubr.f32.mxu1 %v1202_v4 }
  0x78   :  { %561 = vmatmul.mubr.f32.gmra.mrb[32].mxu0 %v299_v43 }
  0x79   :  { %819 = vmatmul.mubr.f32.gmra.mrb[32].mxu1 %v342_v44  ;;  %566 = vmatprep.mubr.f32.mxu0 %v1202_v4 }
  0x7a   :  { %824 = vmatprep.mubr.f32.mxu1 %v1202_v4 }
  0x7c   :  { %567 = vmatmul.mubr.f32.gmra.mrb[34].mxu0 %v300_v45 }
  0x7d   :  { %825 = vmatmul.mubr.f32.gmra.mrb[34].mxu1 %v343_v46  ;;  %572 = vmatprep.mubr.f32.mxu0 %v1202_v4 }
  0x7e   :  { %830 = vmatprep.mubr.f32.mxu1 %v1202_v4 }
  0x80   :  { %573 = vmatmul.mubr.f32.gmra.mrb[36].mxu0 %v301_v47 }
  0x81   :  { %831 = vmatmul.mubr.f32.gmra.mrb[36].mxu1 %v344_v48  ;;  %578 = vmatprep.mubr.f32.mxu0 %v1202_v4 }
  0x82   :  { %836 = vmatprep.mubr.f32.mxu1 %v1202_v4 }
  0x84   :  { %579 = vmatmul.mubr.f32.gmra.mrb[38].mxu0 %v302_v49 }
  0x85   :  { %837 = vmatmul.mubr.f32.gmra.mrb[38].mxu1 %v345_v50  ;;  %584 = vmatprep.mubr.f32.mxu0 %v1202_v4 }
  0x86   :  { %842 = vmatprep.mubr.f32.mxu1 %v1202_v4 }
  0x88   :  { %585 = vmatmul.mubr.f32.gmra.mrb[40].mxu0 %v303_v51 }
  0x89   :  { %843 = vmatmul.mubr.f32.gmra.mrb[40].mxu1 %v346_v52  ;;  %590 = vmatprep.mubr.f32.mxu0 %v1202_v4 }
  0x8a   :  { %848 = vmatprep.mubr.f32.mxu1 %v1202_v4 }
  0x8c   :  { %591 = vmatmul.mubr.f32.gmra.mrb[42].mxu0 %v304_v53 }
  0x8d   :  { %849 = vmatmul.mubr.f32.gmra.mrb[42].mxu1 %v347_v54  ;;  %596 = vmatprep.mubr.f32.mxu0 %v1202_v4 }
  0x8e   :  { %854 = vmatprep.mubr.f32.mxu1 %v1202_v4 }
  0x90   :  { %597 = vmatmul.mubr.f32.gmra.mrb[44].mxu0 %v305_v55 }
  0x91   :  { %855 = vmatmul.mubr.f32.gmra.mrb[44].mxu1 %v348_v56  ;;  %602 = vmatprep.mubr.f32.mxu0 %v1202_v4 }
  0x92   :  { %860 = vmatprep.mubr.f32.mxu1 %v1202_v4 }
  0x94   :  { %603 = vmatmul.mubr.f32.gmra.mrb[46].mxu0 %v306_v57 }
  0x95   :  { %861 = vmatmul.mubr.f32.gmra.mrb[46].mxu1 %v349_v58  ;;  %608 = vmatprep.mubr.f32.mxu0 %v1202_v4 }
  0x96   :  { %866 = vmatprep.mubr.f32.mxu1 %v1202_v4 }
  0x98   :  { %609 = vmatmul.mubr.f32.gmra.mrb[48].mxu0 %v307_v59 }
  0x99   :  { %867 = vmatmul.mubr.f32.gmra.mrb[48].mxu1 %v350_v60  ;;  %614 = vmatprep.mubr.f32.mxu0 %v1202_v4 }
  0x9a   :  { %872 = vmatprep.mubr.f32.mxu1 %v1202_v4 }
  0x9c   :  { %615 = vmatmul.mubr.f32.gmra.mrb[50].mxu0 %v308_v61 }
  0x9d   :  { %873 = vmatmul.mubr.f32.gmra.mrb[50].mxu1 %v351_v62  ;;  %620 = vmatprep.mubr.f32.mxu0 %v1202_v4 }
  0x9e   :  { %878 = vmatprep.mubr.f32.mxu1 %v1202_v4 }
  0xa0   :  { %621 = vmatmul.mubr.f32.gmra.mrb[52].mxu0 %v309_v63 }
  0xa1   :  { %879 = vmatmul.mubr.f32.gmra.mrb[52].mxu1 %v352_v0  ;;  %626 = vmatprep.mubr.f32.mxu0 %v1202_v4 }
  0xa2   :  { %884 = vmatprep.mubr.f32.mxu1 %v1202_v4 }
  0xa4   :  { %627 = vmatmul.mubr.f32.gmra.mrb[54].mxu0 %v310_v1 }
  0xa5   :  { %885 = vmatmul.mubr.f32.gmra.mrb[54].mxu1 %v353_v2  ;;  %632 = vmatprep.mubr.f32.mxu0 %v1202_v4 }
  0xa6   :  { %890 = vmatprep.mubr.f32.mxu1 %v1202_v4 }
  0xa8   :  { %633 = vmatmul.mubr.f32.gmra.mrb[56].mxu0 %v311_v3 }
  0xa9   :  { %891 = vmatmul.mubr.f32.gmra.mrb[56].mxu1 %v354_v5  ;;  %638 = vmatprep.mubr.f32.mxu0 %v1202_v4 }
  0xaa   :  { %896 = vmatprep.mubr.f32.mxu1 %v1202_v4 }
  0xac   :  { %639 = vmatmul.mubr.f32.gmra.mrb[58].mxu0 %v312_v6 }
  0xad   :  { %897 = vmatmul.mubr.f32.gmra.mrb[58].mxu1 %v355_v7  ;;  %644 = vmatprep.mubr.f32.mxu0 %v1202_v4 }
  0xae   :  { %902 = vmatprep.mubr.f32.mxu1 %v1202_v4 }
  0xb0   :  { %645 = vmatmul.mubr.f32.gmra.mrb[60].mxu0 %v313_v8 }
  0xb1   :  { %903 = vmatmul.mubr.f32.gmra.mrb[60].mxu1 %v356_v9  ;;  %650 = vmatprep.mubr.f32.mxu0 %v1202_v4 }
  0xb2   :  { %908 = vmatprep.mubr.f32.mxu1 %v1202_v4 }
  0xb4   :  { %651 = vmatmul.mubr.f32.gmra.mrb[62].mxu0 %v314_v10 }
  0xb5   :  { %909 = vmatmul.mubr.f32.gmra.mrb[62].mxu1 %v357_v11  ;;  %656 = vmatprep.mubr.f32.mxu0 %v1202_v4 }
  0xb6   :  { %914 = vmatprep.mubr.f32.mxu1 %v1202_v4 }
  0xb8   :  { %657 = vmatmul.mubr.f32.gmra.mrb[64].mxu0 %v315_v12 }
  0xb9   :  { %915 = vmatmul.mubr.f32.gmra.mrb[64].mxu1 %v358_v13  ;;  %662 = vmatprep.mubr.f32.mxu0 %v1202_v4 }
  0xba   :  { %920 = vmatprep.mubr.f32.mxu1 %v1202_v4 }
  0xbc   :  { %663 = vmatmul.mubr.f32.gmra.mrb[66].mxu0 %v316_v14 }
  0xbd   :  { %921 = vmatmul.mubr.f32.gmra.mrb[66].mxu1 %v359_v15  ;;  %668 = vmatprep.mubr.f32.mxu0 %v1202_v4 }
  0xbe   :  { %926 = vmatprep.mubr.f32.mxu1 %v1202_v4 }
  0xc0   :  { %669 = vmatmul.mubr.f32.gmra.mrb[68].mxu0 %v317_v16 }
  0xc1   :  { %927 = vmatmul.mubr.f32.gmra.mrb[68].mxu1 %v360_v17  ;;  %674 = vmatprep.mubr.f32.mxu0 %v1202_v4 }
  0xc2   :  { %932 = vmatprep.mubr.f32.mxu1 %v1202_v4 }
  0xc4   :  { %675 = vmatmul.mubr.f32.gmra.mrb[70].mxu0 %v318_v18 }
  0xc5   :  { %933 = vmatmul.mubr.f32.gmra.mrb[70].mxu1 %v361_v19  ;;  %680 = vmatprep.mubr.f32.mxu0 %v1202_v4 }
  0xc6   :  { %938 = vmatprep.mubr.f32.mxu1 %v1202_v4 }
  0xc8   :  { %681 = vmatmul.mubr.f32.gmra.mrb[72].mxu0 %v319_v20 }
  0xc9   :  { %939 = vmatmul.mubr.f32.gmra.mrb[72].mxu1 %v362_v21  ;;  %686 = vmatprep.mubr.f32.mxu0 %v1202_v4 }
  0xca   :  { %944 = vmatprep.mubr.f32.mxu1 %v1202_v4 }
  0xcc   :  { %687 = vmatmul.mubr.f32.gmra.mrb[74].mxu0 %v320_v22 }
  0xcd   :  { %945 = vmatmul.mubr.f32.gmra.mrb[74].mxu1 %v363_v23  ;;  %692 = vmatprep.mubr.f32.mxu0 %v1202_v4 }
  0xce   :  { %950 = vmatprep.mubr.f32.mxu1 %v1202_v4 }
  0xd0   :  { %693 = vmatmul.mubr.f32.gmra.mrb[76].mxu0 %v321_v24 }
  0xd1   :  { %951 = vmatmul.mubr.f32.gmra.mrb[76].mxu1 %v364_v25  ;;  %698 = vmatprep.mubr.f32.mxu0 %v1202_v4 }
  0xd2   :  { %956 = vmatprep.mubr.f32.mxu1 %v1202_v4 }
  0xd4   :  { %699 = vmatmul.mubr.f32.gmra.mrb[78].mxu0 %v322_v26 }
  0xd5   :  { %957 = vmatmul.mubr.f32.gmra.mrb[78].mxu1 %v365_v27  ;;  %704 = vmatprep.mubr.f32.mxu0 %v1202_v4 }
  0xd6   :  { %962 = vmatprep.mubr.f32.mxu1 %v1202_v4 }
  0xd8   :  { %705 = vmatmul.mubr.f32.gmra.mrb[80].mxu0 %v323_v28 }
  0xd9   :  { %963 = vmatmul.mubr.f32.gmra.mrb[80].mxu1 %v366_v29  ;;  %710 = vmatprep.mubr.f32.mxu0 %v1202_v4 }
  0xda   :  { %968 = vmatprep.mubr.f32.mxu1 %v1202_v4 }
  0xdc   :  { %711 = vmatmul.mubr.f32.gmra.mrb[82].mxu0 %v324_v30 }
  0xdd   :  { %969 = vmatmul.mubr.f32.gmra.mrb[82].mxu1 %v367_v31  ;;  %716 = vmatprep.mubr.f32.mxu0 %v1202_v4 }
  0xe0   :  { %717 = vmatmul.mubr.f32.gmra.mrb[84].mxu0 %v325_v32 }
 0x10b   :  { %v466_v33 = vpop.f32.mrb[0].mxu0 }
 0x10c   :  { %v724_v34 = vpop.f32.mrb[0].mxu1  ;;  %975 = vst [vmem:[%s2376_s5] sm:$0xff] %v466_v33  ;;  %v468_v35 = vpop.f32.mrb[1].mxu0 }
 0x10d   :  { %1018 = vst [vmem:[%s2376_s5 + $0x158] sm:$0xff] %v724_v34  ;;  %v726_v36 = vpop.f32.mrb[1].mxu1  ;;  %1060 = vst [vmem:[%s2377_s6] sm:$0xff] %v468_v35 }
 0x10e   :  { %1103 = vst [vmem:[%s2377_s6 + $0x158] sm:$0xff] %v726_v36 }
 0x10f   :  { %v472_v4 = vpop.f32.mrb[2].mxu0 }
 0x110   :  { %v730_v37 = vpop.f32.mrb[2].mxu1  ;;  %976 = vst [vmem:[%s2376_s5 + $0x8] sm:$0xff] %v472_v4  ;;  %v474_v38 = vpop.f32.mrb[3].mxu0 }
 0x111   :  { %1019 = vst [vmem:[%s2376_s5 + $0x160] sm:$0xff] %v730_v37  ;;  %v732_v39 = vpop.f32.mrb[3].mxu1  ;;  %1061 = vst [vmem:[%s2377_s6 + $0x8] sm:$0xff] %v474_v38 }
 0x112   :  { %1104 = vst [vmem:[%s2377_s6 + $0x160] sm:$0xff] %v732_v39 }
 0x113   :  { %v478_v40 = vpop.f32.mrb[4].mxu0 }
 0x114   :  { %v736_v41 = vpop.f32.mrb[4].mxu1  ;;  %977 = vst [vmem:[%s2376_s5 + $0x10] sm:$0xff] %v478_v40  ;;  %v480_v42 = vpop.f32.mrb[5].mxu0 }
 0x115   :  { %1020 = vst [vmem:[%s2376_s5 + $0x168] sm:$0xff] %v736_v41  ;;  %v738_v43 = vpop.f32.mrb[5].mxu1  ;;  %1062 = vst [vmem:[%s2377_s6 + $0x10] sm:$0xff] %v480_v42 }
 0x116   :  { %1105 = vst [vmem:[%s2377_s6 + $0x168] sm:$0xff] %v738_v43 }
 0x117   :  { %v484_v44 = vpop.f32.mrb[6].mxu0 }
 0x118   :  { %v742_v45 = vpop.f32.mrb[6].mxu1  ;;  %978 = vst [vmem:[%s2376_s5 + $0x18] sm:$0xff] %v484_v44  ;;  %v486_v46 = vpop.f32.mrb[7].mxu0 }
 0x119   :  { %1021 = vst [vmem:[%s2376_s5 + $0x170] sm:$0xff] %v742_v45  ;;  %v744_v47 = vpop.f32.mrb[7].mxu1  ;;  %1063 = vst [vmem:[%s2377_s6 + $0x18] sm:$0xff] %v486_v46 }
 0x11a   :  { %1106 = vst [vmem:[%s2377_s6 + $0x170] sm:$0xff] %v744_v47 }
 0x11b   :  { %v490_v48 = vpop.f32.mrb[8].mxu0 }
 0x11c   :  { %v748_v49 = vpop.f32.mrb[8].mxu1  ;;  %979 = vst [vmem:[%s2376_s5 + $0x20] sm:$0xff] %v490_v48  ;;  %v492_v50 = vpop.f32.mrb[9].mxu0 }
 0x11d   :  { %1022 = vst [vmem:[%s2376_s5 + $0x178] sm:$0xff] %v748_v49  ;;  %v750_v51 = vpop.f32.mrb[9].mxu1  ;;  %1064 = vst [vmem:[%s2377_s6 + $0x20] sm:$0xff] %v492_v50 }
 0x11e   :  { %1107 = vst [vmem:[%s2377_s6 + $0x178] sm:$0xff] %v750_v51 }
 0x11f   :  { %v496_v52 = vpop.f32.mrb[10].mxu0 }
 0x120   :  { %v754_v53 = vpop.f32.mrb[10].mxu1  ;;  %980 = vst [vmem:[%s2376_s5 + $0x28] sm:$0xff] %v496_v52  ;;  %v498_v54 = vpop.f32.mrb[11].mxu0 }
 0x121   :  { %1023 = vst [vmem:[%s2376_s5 + $0x180] sm:$0xff] %v754_v53  ;;  %v756_v55 = vpop.f32.mrb[11].mxu1  ;;  %1065 = vst [vmem:[%s2377_s6 + $0x28] sm:$0xff] %v498_v54 }
 0x122   :  { %1108 = vst [vmem:[%s2377_s6 + $0x180] sm:$0xff] %v756_v55 }
 0x123   :  { %v502_v56 = vpop.f32.mrb[12].mxu0 }
 0x124   :  { %v760_v57 = vpop.f32.mrb[12].mxu1  ;;  %981 = vst [vmem:[%s2376_s5 + $0x30] sm:$0xff] %v502_v56  ;;  %v504_v58 = vpop.f32.mrb[13].mxu0 }
 0x125   :  { %1024 = vst [vmem:[%s2376_s5 + $0x188] sm:$0xff] %v760_v57  ;;  %v762_v59 = vpop.f32.mrb[13].mxu1  ;;  %1066 = vst [vmem:[%s2377_s6 + $0x30] sm:$0xff] %v504_v58 }
 0x126   :  { %1109 = vst [vmem:[%s2377_s6 + $0x188] sm:$0xff] %v762_v59 }
 0x127   :  { %v508_v60 = vpop.f32.mrb[14].mxu0 }
 0x128   :  { %v766_v61 = vpop.f32.mrb[14].mxu1  ;;  %982 = vst [vmem:[%s2376_s5 + $0x38] sm:$0xff] %v508_v60  ;;  %v510_v62 = vpop.f32.mrb[15].mxu0 }
 0x129   :  { %1025 = vst [vmem:[%s2376_s5 + $0x190] sm:$0xff] %v766_v61  ;;  %v768_v63 = vpop.f32.mrb[15].mxu1  ;;  %1067 = vst [vmem:[%s2377_s6 + $0x38] sm:$0xff] %v510_v62 }
 0x12a   :  { %1110 = vst [vmem:[%s2377_s6 + $0x190] sm:$0xff] %v768_v63 }
 0x12b   :  { %v514_v0 = vpop.f32.mrb[16].mxu0 }
 0x12c   :  { %v772_v1 = vpop.f32.mrb[16].mxu1  ;;  %983 = vst [vmem:[%s2376_s5 + $0x40] sm:$0xff] %v514_v0  ;;  %v516_v2 = vpop.f32.mrb[17].mxu0 }
 0x12d   :  { %1026 = vst [vmem:[%s2376_s5 + $0x198] sm:$0xff] %v772_v1  ;;  %v774_v3 = vpop.f32.mrb[17].mxu1  ;;  %1068 = vst [vmem:[%s2377_s6 + $0x40] sm:$0xff] %v516_v2 }
 0x12e   :  { %1111 = vst [vmem:[%s2377_s6 + $0x198] sm:$0xff] %v774_v3 }
 0x12f   :  { %v520_v5 = vpop.f32.mrb[18].mxu0 }
 0x130   :  { %v778_v6 = vpop.f32.mrb[18].mxu1  ;;  %984 = vst [vmem:[%s2376_s5 + $0x48] sm:$0xff] %v520_v5  ;;  %v522_v7 = vpop.f32.mrb[19].mxu0 }
 0x131   :  { %1027 = vst [vmem:[%s2376_s5 + $0x1a0] sm:$0xff] %v778_v6  ;;  %v780_v8 = vpop.f32.mrb[19].mxu1  ;;  %1069 = vst [vmem:[%s2377_s6 + $0x48] sm:$0xff] %v522_v7 }
 0x132   :  { %1112 = vst [vmem:[%s2377_s6 + $0x1a0] sm:$0xff] %v780_v8 }
 0x133   :  { %v526_v9 = vpop.f32.mrb[20].mxu0 }
 0x134   :  { %v784_v10 = vpop.f32.mrb[20].mxu1  ;;  %985 = vst [vmem:[%s2376_s5 + $0x50] sm:$0xff] %v526_v9  ;;  %v528_v11 = vpop.f32.mrb[21].mxu0 }
 0x135   :  { %1028 = vst [vmem:[%s2376_s5 + $0x1a8] sm:$0xff] %v784_v10  ;;  %v786_v12 = vpop.f32.mrb[21].mxu1  ;;  %1070 = vst [vmem:[%s2377_s6 + $0x50] sm:$0xff] %v528_v11 }
 0x136   :  { %1113 = vst [vmem:[%s2377_s6 + $0x1a8] sm:$0xff] %v786_v12 }
 0x137   :  { %v532_v13 = vpop.f32.mrb[22].mxu0 }
 0x138   :  { %v790_v14 = vpop.f32.mrb[22].mxu1  ;;  %986 = vst [vmem:[%s2376_s5 + $0x58] sm:$0xff] %v532_v13  ;;  %v534_v15 = vpop.f32.mrb[23].mxu0 }
 0x139   :  { %1029 = vst [vmem:[%s2376_s5 + $0x1b0] sm:$0xff] %v790_v14  ;;  %v792_v16 = vpop.f32.mrb[23].mxu1  ;;  %1071 = vst [vmem:[%s2377_s6 + $0x58] sm:$0xff] %v534_v15 }
 0x13a   :  { %1114 = vst [vmem:[%s2377_s6 + $0x1b0] sm:$0xff] %v792_v16 }
 0x13b   :  { %v538_v17 = vpop.f32.mrb[24].mxu0 }
 0x13c   :  { %v796_v18 = vpop.f32.mrb[24].mxu1  ;;  %987 = vst [vmem:[%s2376_s5 + $0x60] sm:$0xff] %v538_v17  ;;  %v540_v19 = vpop.f32.mrb[25].mxu0 }
 0x13d   :  { %1030 = vst [vmem:[%s2376_s5 + $0x1b8] sm:$0xff] %v796_v18  ;;  %v798_v20 = vpop.f32.mrb[25].mxu1  ;;  %1072 = vst [vmem:[%s2377_s6 + $0x60] sm:$0xff] %v540_v19 }
 0x13e   :  { %1115 = vst [vmem:[%s2377_s6 + $0x1b8] sm:$0xff] %v798_v20 }
 0x13f   :  { %v544_v21 = vpop.f32.mrb[26].mxu0 }
 0x140   :  { %v802_v22 = vpop.f32.mrb[26].mxu1  ;;  %988 = vst [vmem:[%s2376_s5 + $0x68] sm:$0xff] %v544_v21  ;;  %v546_v23 = vpop.f32.mrb[27].mxu0 }
 0x141   :  { %1031 = vst [vmem:[%s2376_s5 + $0x1c0] sm:$0xff] %v802_v22  ;;  %v804_v24 = vpop.f32.mrb[27].mxu1  ;;  %1073 = vst [vmem:[%s2377_s6 + $0x68] sm:$0xff] %v546_v23 }
 0x142   :  { %1116 = vst [vmem:[%s2377_s6 + $0x1c0] sm:$0xff] %v804_v24 }
 0x143   :  { %v550_v25 = vpop.f32.mrb[28].mxu0 }
 0x144   :  { %v808_v26 = vpop.f32.mrb[28].mxu1  ;;  %989 = vst [vmem:[%s2376_s5 + $0x70] sm:$0xff] %v550_v25  ;;  %v552_v27 = vpop.f32.mrb[29].mxu0 }
 0x145   :  { %1032 = vst [vmem:[%s2376_s5 + $0x1c8] sm:$0xff] %v808_v26  ;;  %v810_v28 = vpop.f32.mrb[29].mxu1  ;;  %1074 = vst [vmem:[%s2377_s6 + $0x70] sm:$0xff] %v552_v27 }
 0x146   :  { %1117 = vst [vmem:[%s2377_s6 + $0x1c8] sm:$0xff] %v810_v28 }
 0x147   :  { %v556_v29 = vpop.f32.mrb[30].mxu0 }
 0x148   :  { %v814_v30 = vpop.f32.mrb[30].mxu1  ;;  %990 = vst [vmem:[%s2376_s5 + $0x78] sm:$0xff] %v556_v29  ;;  %v558_v31 = vpop.f32.mrb[31].mxu0 }
 0x149   :  { %1033 = vst [vmem:[%s2376_s5 + $0x1d0] sm:$0xff] %v814_v30  ;;  %v816_v32 = vpop.f32.mrb[31].mxu1  ;;  %1075 = vst [vmem:[%s2377_s6 + $0x78] sm:$0xff] %v558_v31 }
 0x14a   :  { %1118 = vst [vmem:[%s2377_s6 + $0x1d0] sm:$0xff] %v816_v32 }
 0x14b   :  { %v562_v33 = vpop.f32.mrb[32].mxu0 }
 0x14c   :  { %v820_v34 = vpop.f32.mrb[32].mxu1  ;;  %991 = vst [vmem:[%s2376_s5 + $0x80] sm:$0xff] %v562_v33  ;;  %v564_v35 = vpop.f32.mrb[33].mxu0 }
 0x14d   :  { %1034 = vst [vmem:[%s2376_s5 + $0x1d8] sm:$0xff] %v820_v34  ;;  %v822_v36 = vpop.f32.mrb[33].mxu1  ;;  %1076 = vst [vmem:[%s2377_s6 + $0x80] sm:$0xff] %v564_v35 }
 0x14e   :  { %1119 = vst [vmem:[%s2377_s6 + $0x1d8] sm:$0xff] %v822_v36 }
 0x14f   :  { %v568_v4 = vpop.f32.mrb[34].mxu0 }
 0x150   :  { %v826_v37 = vpop.f32.mrb[34].mxu1  ;;  %992 = vst [vmem:[%s2376_s5 + $0x88] sm:$0xff] %v568_v4  ;;  %v570_v38 = vpop.f32.mrb[35].mxu0 }
 0x151   :  { %1035 = vst [vmem:[%s2376_s5 + $0x1e0] sm:$0xff] %v826_v37  ;;  %v828_v39 = vpop.f32.mrb[35].mxu1  ;;  %1077 = vst [vmem:[%s2377_s6 + $0x88] sm:$0xff] %v570_v38 }
 0x152   :  { %1120 = vst [vmem:[%s2377_s6 + $0x1e0] sm:$0xff] %v828_v39 }
 0x153   :  { %v574_v40 = vpop.f32.mrb[36].mxu0 }
 0x154   :  { %v832_v41 = vpop.f32.mrb[36].mxu1  ;;  %993 = vst [vmem:[%s2376_s5 + $0x90] sm:$0xff] %v574_v40  ;;  %v576_v42 = vpop.f32.mrb[37].mxu0 }
 0x155   :  { %1036 = vst [vmem:[%s2376_s5 + $0x1e8] sm:$0xff] %v832_v41  ;;  %v834_v43 = vpop.f32.mrb[37].mxu1  ;;  %1078 = vst [vmem:[%s2377_s6 + $0x90] sm:$0xff] %v576_v42 }
 0x156   :  { %1121 = vst [vmem:[%s2377_s6 + $0x1e8] sm:$0xff] %v834_v43 }
 0x157   :  { %v580_v44 = vpop.f32.mrb[38].mxu0 }
 0x158   :  { %v838_v45 = vpop.f32.mrb[38].mxu1  ;;  %994 = vst [vmem:[%s2376_s5 + $0x98] sm:$0xff] %v580_v44  ;;  %v582_v46 = vpop.f32.mrb[39].mxu0 }
 0x159   :  { %1037 = vst [vmem:[%s2376_s5 + $0x1f0] sm:$0xff] %v838_v45  ;;  %v840_v47 = vpop.f32.mrb[39].mxu1  ;;  %1079 = vst [vmem:[%s2377_s6 + $0x98] sm:$0xff] %v582_v46 }
 0x15a   :  { %1122 = vst [vmem:[%s2377_s6 + $0x1f0] sm:$0xff] %v840_v47 }
 0x15b   :  { %v586_v48 = vpop.f32.mrb[40].mxu0 }
 0x15c   :  { %v844_v49 = vpop.f32.mrb[40].mxu1  ;;  %995 = vst [vmem:[%s2376_s5 + $0xa0] sm:$0xff] %v586_v48  ;;  %v588_v50 = vpop.f32.mrb[41].mxu0 }
 0x15d   :  { %1038 = vst [vmem:[%s2376_s5 + $0x1f8] sm:$0xff] %v844_v49  ;;  %v846_v51 = vpop.f32.mrb[41].mxu1  ;;  %1080 = vst [vmem:[%s2377_s6 + $0xa0] sm:$0xff] %v588_v50 }
 0x15e   :  { %1123 = vst [vmem:[%s2377_s6 + $0x1f8] sm:$0xff] %v846_v51 }
 0x15f   :  { %v592_v52 = vpop.f32.mrb[42].mxu0 }
 0x160   :  { %v850_v53 = vpop.f32.mrb[42].mxu1  ;;  %996 = vst [vmem:[%s2376_s5 + $0xa8] sm:$0xff] %v592_v52  ;;  %v594_v54 = vpop.f32.mrb[43].mxu0 }
 0x161   :  { %1039 = vst [vmem:[%s2376_s5 + $0x200] sm:$0xff] %v850_v53  ;;  %v852_v55 = vpop.f32.mrb[43].mxu1  ;;  %1081 = vst [vmem:[%s2377_s6 + $0xa8] sm:$0xff] %v594_v54 }
 0x162   :  { %1124 = vst [vmem:[%s2377_s6 + $0x200] sm:$0xff] %v852_v55 }
 0x163   :  { %v598_v56 = vpop.f32.mrb[44].mxu0 }
 0x164   :  { %v856_v57 = vpop.f32.mrb[44].mxu1  ;;  %997 = vst [vmem:[%s2376_s5 + $0xb0] sm:$0xff] %v598_v56  ;;  %v600_v58 = vpop.f32.mrb[45].mxu0 }
 0x165   :  { %1040 = vst [vmem:[%s2376_s5 + $0x208] sm:$0xff] %v856_v57  ;;  %v858_v59 = vpop.f32.mrb[45].mxu1  ;;  %1082 = vst [vmem:[%s2377_s6 + $0xb0] sm:$0xff] %v600_v58 }
 0x166   :  { %1125 = vst [vmem:[%s2377_s6 + $0x208] sm:$0xff] %v858_v59 }
 0x167   :  { %v604_v60 = vpop.f32.mrb[46].mxu0 }
 0x168   :  { %v862_v61 = vpop.f32.mrb[46].mxu1  ;;  %998 = vst [vmem:[%s2376_s5 + $0xb8] sm:$0xff] %v604_v60  ;;  %v606_v62 = vpop.f32.mrb[47].mxu0 }
 0x169   :  { %1041 = vst [vmem:[%s2376_s5 + $0x210] sm:$0xff] %v862_v61  ;;  %v864_v63 = vpop.f32.mrb[47].mxu1  ;;  %1083 = vst [vmem:[%s2377_s6 + $0xb8] sm:$0xff] %v606_v62 }
 0x16a   :  { %1126 = vst [vmem:[%s2377_s6 + $0x210] sm:$0xff] %v864_v63 }
 0x16b   :  { %v610_v0 = vpop.f32.mrb[48].mxu0 }
 0x16c   :  { %v868_v1 = vpop.f32.mrb[48].mxu1  ;;  %999 = vst [vmem:[%s2376_s5 + $0xc0] sm:$0xff] %v610_v0  ;;  %v612_v2 = vpop.f32.mrb[49].mxu0 }
 0x16d   :  { %1042 = vst [vmem:[%s2376_s5 + $0x218] sm:$0xff] %v868_v1  ;;  %v870_v3 = vpop.f32.mrb[49].mxu1  ;;  %1084 = vst [vmem:[%s2377_s6 + $0xc0] sm:$0xff] %v612_v2 }
 0x16e   :  { %1127 = vst [vmem:[%s2377_s6 + $0x218] sm:$0xff] %v870_v3 }
 0x16f   :  { %v616_v5 = vpop.f32.mrb[50].mxu0 }
 0x170   :  { %v874_v6 = vpop.f32.mrb[50].mxu1  ;;  %1000 = vst [vmem:[%s2376_s5 + $0xc8] sm:$0xff] %v616_v5  ;;  %v618_v7 = vpop.f32.mrb[51].mxu0 }
 0x171   :  { %1043 = vst [vmem:[%s2376_s5 + $0x220] sm:$0xff] %v874_v6  ;;  %v876_v8 = vpop.f32.mrb[51].mxu1  ;;  %1085 = vst [vmem:[%s2377_s6 + $0xc8] sm:$0xff] %v618_v7 }
 0x172   :  { %1128 = vst [vmem:[%s2377_s6 + $0x220] sm:$0xff] %v876_v8 }
 0x173   :  { %v622_v9 = vpop.f32.mrb[52].mxu0 }
 0x174   :  { %v880_v10 = vpop.f32.mrb[52].mxu1  ;;  %1001 = vst [vmem:[%s2376_s5 + $0xd0] sm:$0xff] %v622_v9  ;;  %v624_v11 = vpop.f32.mrb[53].mxu0 }
 0x175   :  { %1044 = vst [vmem:[%s2376_s5 + $0x228] sm:$0xff] %v880_v10  ;;  %v882_v12 = vpop.f32.mrb[53].mxu1  ;;  %1086 = vst [vmem:[%s2377_s6 + $0xd0] sm:$0xff] %v624_v11 }
 0x176   :  { %1129 = vst [vmem:[%s2377_s6 + $0x228] sm:$0xff] %v882_v12 }
 0x177   :  { %v628_v13 = vpop.f32.mrb[54].mxu0 }
 0x178   :  { %v886_v14 = vpop.f32.mrb[54].mxu1  ;;  %1002 = vst [vmem:[%s2376_s5 + $0xd8] sm:$0xff] %v628_v13  ;;  %v630_v15 = vpop.f32.mrb[55].mxu0 }
 0x179   :  { %1045 = vst [vmem:[%s2376_s5 + $0x230] sm:$0xff] %v886_v14  ;;  %v888_v16 = vpop.f32.mrb[55].mxu1  ;;  %1087 = vst [vmem:[%s2377_s6 + $0xd8] sm:$0xff] %v630_v15 }
 0x17a   :  { %1130 = vst [vmem:[%s2377_s6 + $0x230] sm:$0xff] %v888_v16 }
 0x17b   :  { %v634_v17 = vpop.f32.mrb[56].mxu0 }
 0x17c   :  { %v892_v18 = vpop.f32.mrb[56].mxu1  ;;  %1003 = vst [vmem:[%s2376_s5 + $0xe0] sm:$0xff] %v634_v17  ;;  %v636_v19 = vpop.f32.mrb[57].mxu0 }
 0x17d   :  { %1046 = vst [vmem:[%s2376_s5 + $0x238] sm:$0xff] %v892_v18  ;;  %v894_v20 = vpop.f32.mrb[57].mxu1  ;;  %1088 = vst [vmem:[%s2377_s6 + $0xe0] sm:$0xff] %v636_v19 }
 0x17e   :  { %1131 = vst [vmem:[%s2377_s6 + $0x238] sm:$0xff] %v894_v20 }
 0x17f   :  { %v640_v21 = vpop.f32.mrb[58].mxu0 }
 0x180   :  { %v898_v22 = vpop.f32.mrb[58].mxu1  ;;  %1004 = vst [vmem:[%s2376_s5 + $0xe8] sm:$0xff] %v640_v21  ;;  %v642_v23 = vpop.f32.mrb[59].mxu0 }
 0x181   :  { %1047 = vst [vmem:[%s2376_s5 + $0x240] sm:$0xff] %v898_v22  ;;  %v900_v24 = vpop.f32.mrb[59].mxu1  ;;  %1089 = vst [vmem:[%s2377_s6 + $0xe8] sm:$0xff] %v642_v23 }
 0x182   :  { %1132 = vst [vmem:[%s2377_s6 + $0x240] sm:$0xff] %v900_v24 }
 0x183   :  { %v646_v25 = vpop.f32.mrb[60].mxu0 }
 0x184   :  { %v904_v26 = vpop.f32.mrb[60].mxu1  ;;  %1005 = vst [vmem:[%s2376_s5 + $0xf0] sm:$0xff] %v646_v25  ;;  %v648_v27 = vpop.f32.mrb[61].mxu0 }
 0x185   :  { %1048 = vst [vmem:[%s2376_s5 + $0x248] sm:$0xff] %v904_v26  ;;  %v906_v28 = vpop.f32.mrb[61].mxu1  ;;  %1090 = vst [vmem:[%s2377_s6 + $0xf0] sm:$0xff] %v648_v27 }
 0x186   :  { %1133 = vst [vmem:[%s2377_s6 + $0x248] sm:$0xff] %v906_v28 }
 0x187   :  { %v652_v29 = vpop.f32.mrb[62].mxu0 }
 0x188   :  { %v910_v30 = vpop.f32.mrb[62].mxu1  ;;  %1006 = vst [vmem:[%s2376_s5 + $0xf8] sm:$0xff] %v652_v29  ;;  %v654_v31 = vpop.f32.mrb[63].mxu0 }
 0x189   :  { %1049 = vst [vmem:[%s2376_s5 + $0x250] sm:$0xff] %v910_v30  ;;  %v912_v32 = vpop.f32.mrb[63].mxu1  ;;  %1091 = vst [vmem:[%s2377_s6 + $0xf8] sm:$0xff] %v654_v31 }
 0x18a   :  { %1134 = vst [vmem:[%s2377_s6 + $0x250] sm:$0xff] %v912_v32 }
 0x18b   :  { %v658_v33 = vpop.f32.mrb[64].mxu0 }
 0x18c   :  { %v916_v34 = vpop.f32.mrb[64].mxu1  ;;  %1007 = vst [vmem:[%s2376_s5 + $0x100] sm:$0xff] %v658_v33  ;;  %v660_v35 = vpop.f32.mrb[65].mxu0 }
 0x18d   :  { %1050 = vst [vmem:[%s2376_s5 + $0x258] sm:$0xff] %v916_v34  ;;  %v918_v36 = vpop.f32.mrb[65].mxu1  ;;  %1092 = vst [vmem:[%s2377_s6 + $0x100] sm:$0xff] %v660_v35 }
 0x18e   :  { %1135 = vst [vmem:[%s2377_s6 + $0x258] sm:$0xff] %v918_v36 }
 0x18f   :  { %v664_v4 = vpop.f32.mrb[66].mxu0 }
 0x190   :  { %v922_v37 = vpop.f32.mrb[66].mxu1  ;;  %1008 = vst [vmem:[%s2376_s5 + $0x108] sm:$0xff] %v664_v4  ;;  %v666_v38 = vpop.f32.mrb[67].mxu0 }
 0x191   :  { %1051 = vst [vmem:[%s2376_s5 + $0x260] sm:$0xff] %v922_v37  ;;  %v924_v39 = vpop.f32.mrb[67].mxu1  ;;  %1093 = vst [vmem:[%s2377_s6 + $0x108] sm:$0xff] %v666_v38 }
 0x192   :  { %1136 = vst [vmem:[%s2377_s6 + $0x260] sm:$0xff] %v924_v39 }
 0x193   :  { %v670_v40 = vpop.f32.mrb[68].mxu0 }
 0x194   :  { %v928_v41 = vpop.f32.mrb[68].mxu1  ;;  %1009 = vst [vmem:[%s2376_s5 + $0x110] sm:$0xff] %v670_v40  ;;  %v672_v42 = vpop.f32.mrb[69].mxu0 }
 0x195   :  { %1052 = vst [vmem:[%s2376_s5 + $0x268] sm:$0xff] %v928_v41  ;;  %v930_v43 = vpop.f32.mrb[69].mxu1  ;;  %1094 = vst [vmem:[%s2377_s6 + $0x110] sm:$0xff] %v672_v42 }
 0x196   :  { %1137 = vst [vmem:[%s2377_s6 + $0x268] sm:$0xff] %v930_v43 }
 0x197   :  { %v676_v44 = vpop.f32.mrb[70].mxu0 }
 0x198   :  { %v934_v45 = vpop.f32.mrb[70].mxu1  ;;  %1010 = vst [vmem:[%s2376_s5 + $0x118] sm:$0xff] %v676_v44  ;;  %v678_v46 = vpop.f32.mrb[71].mxu0 }
 0x199   :  { %1053 = vst [vmem:[%s2376_s5 + $0x270] sm:$0xff] %v934_v45  ;;  %v936_v47 = vpop.f32.mrb[71].mxu1  ;;  %1095 = vst [vmem:[%s2377_s6 + $0x118] sm:$0xff] %v678_v46 }
 0x19a   :  { %1138 = vst [vmem:[%s2377_s6 + $0x270] sm:$0xff] %v936_v47 }
 0x19b   :  { %v682_v48 = vpop.f32.mrb[72].mxu0 }
 0x19c   :  { %v940_v49 = vpop.f32.mrb[72].mxu1  ;;  %1011 = vst [vmem:[%s2376_s5 + $0x120] sm:$0xff] %v682_v48  ;;  %v684_v50 = vpop.f32.mrb[73].mxu0 }
 0x19d   :  { %1054 = vst [vmem:[%s2376_s5 + $0x278] sm:$0xff] %v940_v49  ;;  %v942_v51 = vpop.f32.mrb[73].mxu1  ;;  %1096 = vst [vmem:[%s2377_s6 + $0x120] sm:$0xff] %v684_v50 }
 0x19e   :  { %1139 = vst [vmem:[%s2377_s6 + $0x278] sm:$0xff] %v942_v51 }
 0x19f   :  { %v688_v52 = vpop.f32.mrb[74].mxu0 }
 0x1a0   :  { %v946_v53 = vpop.f32.mrb[74].mxu1  ;;  %1012 = vst [vmem:[%s2376_s5 + $0x128] sm:$0xff] %v688_v52  ;;  %v690_v54 = vpop.f32.mrb[75].mxu0 }
 0x1a1   :  { %1055 = vst [vmem:[%s2376_s5 + $0x280] sm:$0xff] %v946_v53  ;;  %v948_v55 = vpop.f32.mrb[75].mxu1  ;;  %1097 = vst [vmem:[%s2377_s6 + $0x128] sm:$0xff] %v690_v54 }
 0x1a2   :  { %1140 = vst [vmem:[%s2377_s6 + $0x280] sm:$0xff] %v948_v55 }
 0x1a3   :  { %v694_v56 = vpop.f32.mrb[76].mxu0 }
 0x1a4   :  { %v952_v57 = vpop.f32.mrb[76].mxu1  ;;  %1013 = vst [vmem:[%s2376_s5 + $0x130] sm:$0xff] %v694_v56  ;;  %v696_v58 = vpop.f32.mrb[77].mxu0 }
 0x1a5   :  { %1056 = vst [vmem:[%s2376_s5 + $0x288] sm:$0xff] %v952_v57  ;;  %v954_v59 = vpop.f32.mrb[77].mxu1  ;;  %1098 = vst [vmem:[%s2377_s6 + $0x130] sm:$0xff] %v696_v58 }
 0x1a6   :  { %1141 = vst [vmem:[%s2377_s6 + $0x288] sm:$0xff] %v954_v59 }
 0x1a7   :  { %v700_v60 = vpop.f32.mrb[78].mxu0 }
 0x1a8   :  { %v958_v61 = vpop.f32.mrb[78].mxu1  ;;  %1014 = vst [vmem:[%s2376_s5 + $0x138] sm:$0xff] %v700_v60  ;;  %v702_v62 = vpop.f32.mrb[79].mxu0 }
 0x1a9   :  { %1057 = vst [vmem:[%s2376_s5 + $0x290] sm:$0xff] %v958_v61  ;;  %v960_v63 = vpop.f32.mrb[79].mxu1  ;;  %1099 = vst [vmem:[%s2377_s6 + $0x138] sm:$0xff] %v702_v62 }
 0x1aa   :  { %1142 = vst [vmem:[%s2377_s6 + $0x290] sm:$0xff] %v960_v63 }
 0x1ab   :  { %v706_v0 = vpop.f32.mrb[80].mxu0 }
 0x1ac   :  { %v964_v1 = vpop.f32.mrb[80].mxu1  ;;  %1015 = vst [vmem:[%s2376_s5 + $0x140] sm:$0xff] %v706_v0  ;;  %v708_v2 = vpop.f32.mrb[81].mxu0 }
 0x1ad   :  { %1058 = vst [vmem:[%s2376_s5 + $0x298] sm:$0xff] %v964_v1  ;;  %v966_v3 = vpop.f32.mrb[81].mxu1  ;;  %1100 = vst [vmem:[%s2377_s6 + $0x140] sm:$0xff] %v708_v2 }
 0x1ae   :  { %1143 = vst [vmem:[%s2377_s6 + $0x298] sm:$0xff] %v966_v3 }
 0x1af   :  { %v712_v5 = vpop.f32.mrb[82].mxu0 }
 0x1b0   :  { %v970_v6 = vpop.f32.mrb[82].mxu1  ;;  %1016 = vst [vmem:[%s2376_s5 + $0x148] sm:$0xff] %v712_v5  ;;  %v714_v7 = vpop.f32.mrb[83].mxu0 }
 0x1b1   :  { %1059 = vst [vmem:[%s2376_s5 + $0x2a0] sm:$0xff] %v970_v6  ;;  %v972_v8 = vpop.f32.mrb[83].mxu1  ;;  %1101 = vst [vmem:[%s2377_s6 + $0x148] sm:$0xff] %v714_v7 }
 0x1b2   :  { %1144 = vst [vmem:[%s2377_s6 + $0x2a0] sm:$0xff] %v972_v8 }
 0x1b3   :  { %v718_v9 = vpop.f32.mrb[84].mxu0 }
 0x1b4   :  { %1017 = vst [vmem:[%s2376_s5 + $0x150] sm:$0xff] %v718_v9  ;;  %v720_v10 = vpop.f32.mrb[85].mxu0 }
 0x1b5   :  { %1102 = vst [vmem:[%s2377_s6 + $0x150] sm:$0xff] %v720_v10 }

</bundles_post_ra>
